<compile_context>
chip_gen: v7x
topology: tpu7x:2x2x1
jax: 0.10.0
libtpu: 0.0.40
codegen_flags: <defaults>
</compile_context>

<pallas_src>
import jax
import jax.numpy as jnp
from jax import lax
from jax.experimental import pallas as pl
from jax.experimental.pallas import tpu as pltpu


def _round_up(x, m):
    return (x + m - 1) // m * m


def _sigmoid(z):
    # Exact sigmoid via tanh: one EUP push per gate (vs exp + reciprocal).
    return 0.5 * jnp.tanh(0.5 * z) + 0.5


def _vmem_limit_bytes():
    cap = 64 * 1024 * 1024
    try:
        cap = int(getattr(pltpu.get_tpu_info(), "vmem_capacity_bytes", cap))
    except Exception:
        pass
    # ~3/4 of physical: ≈96 MiB on v5e/v6e (128 MiB VMEM), ≈48 MiB on v7x (64 MiB).
    return min(cap * 3 // 4, 100 * 1024 * 1024)


def _make_kernel(T, tile_t, Hp, unroll):
    """Builds the LSTM recurrence + Linear epilogue kernel (static shapes closed over)."""
    need_mask = (T % tile_t) != 0

    def kernel(xproj_ref, whh_ref, wlin_ref, blin_ref, out_ref, h_scr, c_scr):
        # Grid: (batch blocks [parallel], time blocks [arbitrary, innermost]).
        j = pl.program_id(1)

        @pl.when(j == 0)
        def _():
            h_scr[...] = jnp.zeros_like(h_scr)
            c_scr[...] = jnp.zeros_like(c_scr)

        def step(t, carry):
            h, c = carry
            # Precomputed input projection tile + recurrence matmul (MXU).
            gates = xproj_ref[t] + jnp.dot(
                h, whh_ref[...], preferred_element_type=jnp.float32)  # (Bb, 4Hp)
            # Lane-aligned gate views (Hp is a multiple of 128). Order: i, f, g, o.
            i_g = _sigmoid(gates[:, 0 * Hp:1 * Hp])
            f_g = _sigmoid(gates[:, 1 * Hp:2 * Hp])
            g_g = jnp.tanh(gates[:, 2 * Hp:3 * Hp])
            o_g = _sigmoid(gates[:, 3 * Hp:4 * Hp])
            c_new = f_g * c + i_g * g_g
            h_new = o_g * jnp.tanh(c_new)
            if need_mask:  # only for a ragged final time block
                valid = (j * tile_t + t) < T
                h_new = jnp.where(valid, h_new, h)
                c_new = jnp.where(valid, c_new, c)
            return h_new, c_new

        h, c = lax.fori_loop(0, tile_t, step, (h_scr[...], c_scr[...]),
                             unroll=unroll)
        h_scr[...] = h
        c_scr[...] = c

        @pl.when(j == pl.num_programs(1) - 1)
        def _():
            # Fused Linear epilogue; full-vreg, lane-dense store.
            out_ref[...] = (
                jnp.dot(h, wlin_ref[...], preferred_element_type=jnp.float32)
                + blin_ref[...]
            ).astype(out_ref.dtype)

    return kernel


def energy_lstm_forward(x, params):
    """x: (B, T, I) batch-first, like the PyTorch module. Returns (B, O)."""
    B, T, I = x.shape
    H = params["weight_hh"].shape[1]
    O = params["linear_w"].shape[0]
    f32 = jnp.float32

    Hp = _round_up(H, 128)            # lane-align every gate block
    Op = _round_up(O, 128)            # lane-dense output store
    Bb = min(_round_up(B, 8), 128)    # batch rows per block (<= MXU M width)
    nB = -(-B // Bb)
    Bp = nB * Bb
    tile_t = min(T, 32)               # timesteps streamed per grid step
    nT = -(-T // tile_t)
    Tp = nT * tile_t
    unroll = True if tile_t <= 8 else 2

    # ---------- layout prep (plain XLA glue; all pads are zeros) ----------
    # Hoisted input projection: xproj = x @ W_ih^T + (b_ih + b_hh).
    wih = params["weight_ih"].astype(f32)                        # (4H, I)
    b = (params["bias_ih"] + params["bias_hh"]).astype(f32)      # (4H,)
    xproj = jnp.einsum("bti,gi->btg", x.astype(f32), wih) + b    # (B, T, 4H)
    xproj = xproj.reshape(B, T, 4, H)
    xproj = jnp.pad(xproj, ((0, 0), (0, 0), (0, 0), (0, Hp - H)))
    xproj = xproj.reshape(B, T, 4 * Hp)
    xproj = jnp.transpose(xproj, (1, 0, 2))                      # (T, B, 4Hp)
    xproj = jnp.pad(xproj, ((0, Tp - T), (0, Bp - B), (0, 0)))   # (Tp, Bp, 4Hp)

    # Gate-blocked transposed W_hh: (Hp, 4*Hp).
    whh = params["weight_hh"].astype(f32).reshape(4, H, H)       # [gate, out, in]
    whh_t = jnp.transpose(whh, (2, 0, 1))                        # (in, gate, out)
    whh_t = jnp.pad(whh_t, ((0, Hp - H), (0, 0), (0, Hp - H))).reshape(Hp, 4 * Hp)

    # Linear layer: (Hp, Op) and (1, Op).
    wlin_t = jnp.pad(params["linear_w"].astype(f32).T, ((0, Hp - H), (0, Op - O)))
    blin = jnp.pad(params["linear_b"].astype(f32), (0, Op - O)).reshape(1, Op)

    cost = pl.CostEstimate(
        flops=2 * T * Bp * Hp * 4 * Hp + 2 * Bp * Hp * Op,
        transcendentals=5 * T * Bp * Hp,
        bytes_accessed=4 * (xproj.size + whh_t.size + wlin_t.size
                            + blin.size + Bp * Op),
    )

    kernel = _make_kernel(T, tile_t, Hp, unroll)

    out_p = pl.pallas_call(
        kernel,
        out_shape=jax.ShapeDtypeStruct((Bp, Op), f32),
        grid_spec=pltpu.PrefetchScalarGridSpec(
            num_scalar_prefetch=0,
            grid=(nB, nT),
            in_specs=[
                pl.BlockSpec((tile_t, Bb, 4 * Hp), lambda i, j: (j, i, 0)),
                pl.BlockSpec((Hp, 4 * Hp), lambda i, j: (0, 0)),
                pl.BlockSpec((Hp, Op), lambda i, j: (0, 0)),
                pl.BlockSpec((1, Op), lambda i, j: (0, 0)),
            ],
            out_specs=pl.BlockSpec((Bb, Op), lambda i, j: (i, 0)),
            scratch_shapes=[pltpu.VMEM((Bb, Hp), f32),   # h carried across T blocks
                            pltpu.VMEM((Bb, Hp), f32)],  # c carried across T blocks
        ),
        compiler_params=pltpu.CompilerParams(
            dimension_semantics=("parallel", "arbitrary"),
            vmem_limit_bytes=_vmem_limit_bytes(),
        ),
        cost_estimate=cost,
    )(xproj, whh_t, wlin_t, blin)

    return out_p[:B, :O]


def reference_forward(x, params):
    """Pure-JAX reference (same math as torch.nn.LSTM + Linear)."""
    B, T, I = x.shape
    H = params["weight_hh"].shape[1]
    wih, whh = params["weight_ih"], params["weight_hh"]
    b = params["bias_ih"] + params["bias_hh"]

    def step(carry, x_t):
        h, c = carry
        gates = x_t @ wih.T + h @ whh.T + b
        i_g = jax.nn.sigmoid(gates[:, 0 * H:1 * H])
        f_g = jax.nn.sigmoid(gates[:, 1 * H:2 * H])
        g_g = jnp.tanh(gates[:, 2 * H:3 * H])
        o_g = jax.nn.sigmoid(gates[:, 3 * H:4 * H])
        c = f_g * c + i_g * g_g
        h = o_g * jnp.tanh(c)
        return (h, c), None

    h0 = jnp.zeros((B, H), jnp.float32)
    (h_last, _), _ = jax.lax.scan(step, (h0, h0), jnp.transpose(x, (1, 0, 2)))
    return h_last @ params["linear_w"].T + params["linear_b"]


def init_params(key, input_size, hidden_size, output_size):
    """Deterministic synthetic init (uniform ±1/sqrt(H), like PyTorch default)."""
    ks = jax.random.split(key, 6)
    s = 1.0 / jnp.sqrt(hidden_size)
    u = lambda k, shape: jax.random.uniform(k, shape, jnp.float32, -s, s)
    return {
        "weight_ih": u(ks[0], (4 * hidden_size, input_size)),
        "weight_hh": u(ks[1], (4 * hidden_size, hidden_size)),
        "bias_ih": u(ks[2], (4 * hidden_size,)),
        "bias_hh": u(ks[3], (4 * hidden_size,)),
        "linear_w": u(ks[4], (output_size, hidden_size)),
        "linear_b": u(ks[5], (output_size,)),
    }


if __name__ == "__main__":
    B, T, I, H, O = 2, 8, 4, 32, 4

    key = jax.random.PRNGKey(0)
    k_x, k_p = jax.random.split(key)
    x = jax.random.normal(k_x, (B, T, I), jnp.float32)
    params = init_params(k_p, I, H, O)

    out = jax.jit(energy_lstm_forward)(x, params)
    out = jax.block_until_ready(out)

    ref = reference_forward(x, params)
    assert out.shape == (B, O)
    # Exact (tanh-form) sigmoid in the kernel -> tolerance only covers MXU-pass
    # vs XLA-default matmul ordering/precision differences.
    assert jnp.allclose(out, ref, atol=2e-3, rtol=2e-3), (
        f"mismatch vs reference, max abs err={float(jnp.max(jnp.abs(out - ref)))}")

    print("KERNEL_OK")
</pallas_src>

<mosaic_0001>
module attributes {stable_mosaic.version = 11 : i64} {
  func.func @kernel(%arg0: i32, %arg1: i32, %arg2: memref<8x8x512xf32, #tpu.memory_space<vmem>>, %arg3: memref<128x512xf32, #tpu.memory_space<vmem>>, %arg4: memref<128x128xf32, #tpu.memory_space<vmem>>, %arg5: memref<1x128xf32, #tpu.memory_space<vmem>>, %arg6: memref<8x128xf32, #tpu.memory_space<vmem>>, %arg7: memref<8x128xf32, #tpu.memory_space<vmem>>, %arg8: memref<8x128xf32, #tpu.memory_space<vmem>>) attributes {dimension_semantics = [#tpu.dimension_semantics<parallel>, #tpu.dimension_semantics<arbitrary>], iteration_bounds = array<i64: 1, 1>, scalar_prefetch = 0 : i64, scratch_operands = 2 : i64, tpu.core_type = #tpu.core_type<tc>, window_params = [{transform_indices = @transform_0, window_bounds = array<i64: 8, 8, 512>}, {pipeline_mode = #tpu.pipeline_mode<synchronous>, transform_indices = @transform_1, window_bounds = array<i64: 128, 512>}, {pipeline_mode = #tpu.pipeline_mode<synchronous>, transform_indices = @transform_2, window_bounds = array<i64: 128, 128>}, {pipeline_mode = #tpu.pipeline_mode<synchronous>, transform_indices = @transform_3, window_bounds = array<i64: 1, 128>}, {transform_indices = @transform_4, window_bounds = array<i64: 8, 128>}]} {
    %c0_i32 = arith.constant 0 : i32
    %0 = arith.cmpi eq, %arg1, %c0_i32 : i32
    %1 = arith.extui %0 : i1 to i32
    %c0_i32_0 = arith.constant 0 : i32
    %2 = arith.cmpi ne, %1, %c0_i32_0 : i32
    scf.if %2 {
      %cst_122 = arith.constant 0.000000e+00 : f32
      %306 = vector.broadcast %cst_122 : f32 to vector<8x128xf32>
      %c0_123 = arith.constant 0 : index
      %c0_124 = arith.constant 0 : index
      %307 = vector.load %arg7[%c0_123, %c0_124] : memref<8x128xf32, #tpu.memory_space<vmem>>, vector<8x128xf32>
      tpu.vector_store %arg7[%c0_123, %c0_124], %306 {strides = array<i32>} : memref<8x128xf32, #tpu.memory_space<vmem>>, vector<8x128xf32>,
      %cst_125 = arith.constant 0.000000e+00 : f32
      %308 = vector.broadcast %cst_125 : f32 to vector<8x128xf32>
      %c0_126 = arith.constant 0 : index
      %c0_127 = arith.constant 0 : index
      %309 = vector.load %arg8[%c0_126, %c0_127] : memref<8x128xf32, #tpu.memory_space<vmem>>, vector<8x128xf32>
      tpu.vector_store %arg8[%c0_126, %c0_127], %308 {strides = array<i32>} : memref<8x128xf32, #tpu.memory_space<vmem>>, vector<8x128xf32>,
    } else {
    }
    %c0 = arith.constant 0 : index
    %c0_1 = arith.constant 0 : index
    %3 = vector.load %arg7[%c0, %c0_1] : memref<8x128xf32, #tpu.memory_space<vmem>>, vector<8x128xf32>
    %c0_2 = arith.constant 0 : index
    %c0_3 = arith.constant 0 : index
    %4 = vector.load %arg8[%c0_2, %c0_3] : memref<8x128xf32, #tpu.memory_space<vmem>>, vector<8x128xf32>
    %c0_i32_4 = arith.constant 0 : i32
    %5 = arith.index_cast %c0_i32_4 : i32 to index
    %c0_5 = arith.constant 0 : index
    %c0_6 = arith.constant 0 : index
    %6 = vector.load %arg2[%5, %c0_5, %c0_6] : memref<8x8x512xf32, #tpu.memory_space<vmem>>, vector<1x8x512xf32>
    %7 = vector.shape_cast %6 : vector<1x8x512xf32> to vector<8x512xf32>
    %c0_7 = arith.constant 0 : index
    %c0_8 = arith.constant 0 : index
    %8 = vector.load %arg3[%c0_7, %c0_8] : memref<128x512xf32, #tpu.memory_space<vmem>>, vector<128x512xf32>
    %cst = arith.constant dense<0.000000e+00> : vector<8x512xf32>
    %9 = tpu.matmul %3, %8, %cst {dimension_numbers = #tpu.dot_dimension_numbers<[1], [0], [0], [1], [0, 0, 1, 1], [], []>} : vector<8x128xf32>, vector<128x512xf32>, vector<8x512xf32> -> vector<8x512xf32>
    %10 = arith.addf %7, %9 : vector<8x512xf32>
    %11 = vector.extract_strided_slice %10 {offsets = [0, 0], sizes = [8, 128], strides = [1, 1]} : vector<8x512xf32> to vector<8x128xf32>
    %cst_9 = arith.constant 5.000000e-01 : f32
    %12 = vector.broadcast %cst_9 : f32 to vector<8x128xf32>
    %13 = arith.mulf %12, %11 : vector<8x128xf32>
    %14 = math.tanh %13 : vector<8x128xf32>
    %cst_10 = arith.constant 5.000000e-01 : f32
    %15 = vector.broadcast %cst_10 : f32 to vector<8x128xf32>
    %16 = arith.mulf %15, %14 : vector<8x128xf32>
    %cst_11 = arith.constant 5.000000e-01 : f32
    %17 = vector.broadcast %cst_11 : f32 to vector<8x128xf32>
    %18 = arith.addf %16, %17 : vector<8x128xf32>
    %19 = vector.extract_strided_slice %10 {offsets = [0, 128], sizes = [8, 128], strides = [1, 1]} : vector<8x512xf32> to vector<8x128xf32>
    %cst_12 = arith.constant 5.000000e-01 : f32
    %20 = vector.broadcast %cst_12 : f32 to vector<8x128xf32>
    %21 = arith.mulf %20, %19 : vector<8x128xf32>
    %22 = math.tanh %21 : vector<8x128xf32>
    %cst_13 = arith.constant 5.000000e-01 : f32
    %23 = vector.broadcast %cst_13 : f32 to vector<8x128xf32>
    %24 = arith.mulf %23, %22 : vector<8x128xf32>
    %cst_14 = arith.constant 5.000000e-01 : f32
    %25 = vector.broadcast %cst_14 : f32 to vector<8x128xf32>
    %26 = arith.addf %24, %25 : vector<8x128xf32>
    %27 = vector.extract_strided_slice %10 {offsets = [0, 256], sizes = [8, 128], strides = [1, 1]} : vector<8x512xf32> to vector<8x128xf32>
    %28 = math.tanh %27 : vector<8x128xf32>
    %29 = vector.extract_strided_slice %10 {offsets = [0, 384], sizes = [8, 128], strides = [1, 1]} : vector<8x512xf32> to vector<8x128xf32>
    %cst_15 = arith.constant 5.000000e-01 : f32
    %30 = vector.broadcast %cst_15 : f32 to vector<8x128xf32>
    %31 = arith.mulf %30, %29 : vector<8x128xf32>
    %32 = math.tanh %31 : vector<8x128xf32>
    %cst_16 = arith.constant 5.000000e-01 : f32
    %33 = vector.broadcast %cst_16 : f32 to vector<8x128xf32>
    %34 = arith.mulf %33, %32 : vector<8x128xf32>
    %cst_17 = arith.constant 5.000000e-01 : f32
    %35 = vector.broadcast %cst_17 : f32 to vector<8x128xf32>
    %36 = arith.addf %34, %35 : vector<8x128xf32>
    %37 = arith.mulf %26, %4 : vector<8x128xf32>
    %38 = arith.mulf %18, %28 : vector<8x128xf32>
    %39 = arith.addf %37, %38 : vector<8x128xf32>
    %40 = math.tanh %39 : vector<8x128xf32>
    %41 = arith.mulf %36, %40 : vector<8x128xf32>
    %c1_i32 = arith.constant 1 : i32
    %42 = arith.index_cast %c1_i32 : i32 to index
    %c0_18 = arith.constant 0 : index
    %c0_19 = arith.constant 0 : index
    %43 = vector.load %arg2[%42, %c0_18, %c0_19] : memref<8x8x512xf32, #tpu.memory_space<vmem>>, vector<1x8x512xf32>
    %44 = vector.shape_cast %43 : vector<1x8x512xf32> to vector<8x512xf32>
    %c0_20 = arith.constant 0 : index
    %c0_21 = arith.constant 0 : index
    %45 = vector.load %arg3[%c0_20, %c0_21] : memref<128x512xf32, #tpu.memory_space<vmem>>, vector<128x512xf32>
    %cst_22 = arith.constant dense<0.000000e+00> : vector<8x512xf32>
    %46 = tpu.matmul %41, %45, %cst_22 {dimension_numbers = #tpu.dot_dimension_numbers<[1], [0], [0], [1], [0, 0, 1, 1], [], []>} : vector<8x128xf32>, vector<128x512xf32>, vector<8x512xf32> -> vector<8x512xf32>
    %47 = arith.addf %44, %46 : vector<8x512xf32>
    %48 = vector.extract_strided_slice %47 {offsets = [0, 0], sizes = [8, 128], strides = [1, 1]} : vector<8x512xf32> to vector<8x128xf32>
    %cst_23 = arith.constant 5.000000e-01 : f32
    %49 = vector.broadcast %cst_23 : f32 to vector<8x128xf32>
    %50 = arith.mulf %49, %48 : vector<8x128xf32>
    %51 = math.tanh %50 : vector<8x128xf32>
    %cst_24 = arith.constant 5.000000e-01 : f32
    %52 = vector.broadcast %cst_24 : f32 to vector<8x128xf32>
    %53 = arith.mulf %52, %51 : vector<8x128xf32>
    %cst_25 = arith.constant 5.000000e-01 : f32
    %54 = vector.broadcast %cst_25 : f32 to vector<8x128xf32>
    %55 = arith.addf %53, %54 : vector<8x128xf32>
    %56 = vector.extract_strided_slice %47 {offsets = [0, 128], sizes = [8, 128], strides = [1, 1]} : vector<8x512xf32> to vector<8x128xf32>
    %cst_26 = arith.constant 5.000000e-01 : f32
    %57 = vector.broadcast %cst_26 : f32 to vector<8x128xf32>
    %58 = arith.mulf %57, %56 : vector<8x128xf32>
    %59 = math.tanh %58 : vector<8x128xf32>
    %cst_27 = arith.constant 5.000000e-01 : f32
    %60 = vector.broadcast %cst_27 : f32 to vector<8x128xf32>
    %61 = arith.mulf %60, %59 : vector<8x128xf32>
    %cst_28 = arith.constant 5.000000e-01 : f32
    %62 = vector.broadcast %cst_28 : f32 to vector<8x128xf32>
    %63 = arith.addf %61, %62 : vector<8x128xf32>
    %64 = vector.extract_strided_slice %47 {offsets = [0, 256], sizes = [8, 128], strides = [1, 1]} : vector<8x512xf32> to vector<8x128xf32>
    %65 = math.tanh %64 : vector<8x128xf32>
    %66 = vector.extract_strided_slice %47 {offsets = [0, 384], sizes = [8, 128], strides = [1, 1]} : vector<8x512xf32> to vector<8x128xf32>
    %cst_29 = arith.constant 5.000000e-01 : f32
    %67 = vector.broadcast %cst_29 : f32 to vector<8x128xf32>
    %68 = arith.mulf %67, %66 : vector<8x128xf32>
    %69 = math.tanh %68 : vector<8x128xf32>
    %cst_30 = arith.constant 5.000000e-01 : f32
    %70 = vector.broadcast %cst_30 : f32 to vector<8x128xf32>
    %71 = arith.mulf %70, %69 : vector<8x128xf32>
    %cst_31 = arith.constant 5.000000e-01 : f32
    %72 = vector.broadcast %cst_31 : f32 to vector<8x128xf32>
    %73 = arith.addf %71, %72 : vector<8x128xf32>
    %74 = arith.mulf %63, %39 : vector<8x128xf32>
    %75 = arith.mulf %55, %65 : vector<8x128xf32>
    %76 = arith.addf %74, %75 : vector<8x128xf32>
    %77 = math.tanh %76 : vector<8x128xf32>
    %78 = arith.mulf %73, %77 : vector<8x128xf32>
    %c2_i32 = arith.constant 2 : i32
    %79 = arith.index_cast %c2_i32 : i32 to index
    %c0_32 = arith.constant 0 : index
    %c0_33 = arith.constant 0 : index
    %80 = vector.load %arg2[%79, %c0_32, %c0_33] : memref<8x8x512xf32, #tpu.memory_space<vmem>>, vector<1x8x512xf32>
    %81 = vector.shape_cast %80 : vector<1x8x512xf32> to vector<8x512xf32>
    %c0_34 = arith.constant 0 : index
    %c0_35 = arith.constant 0 : index
    %82 = vector.load %arg3[%c0_34, %c0_35] : memref<128x512xf32, #tpu.memory_space<vmem>>, vector<128x512xf32>
    %cst_36 = arith.constant dense<0.000000e+00> : vector<8x512xf32>
    %83 = tpu.matmul %78, %82, %cst_36 {dimension_numbers = #tpu.dot_dimension_numbers<[1], [0], [0], [1], [0, 0, 1, 1], [], []>} : vector<8x128xf32>, vector<128x512xf32>, vector<8x512xf32> -> vector<8x512xf32>
    %84 = arith.addf %81, %83 : vector<8x512xf32>
    %85 = vector.extract_strided_slice %84 {offsets = [0, 0], sizes = [8, 128], strides = [1, 1]} : vector<8x512xf32> to vector<8x128xf32>
    %cst_37 = arith.constant 5.000000e-01 : f32
    %86 = vector.broadcast %cst_37 : f32 to vector<8x128xf32>
    %87 = arith.mulf %86, %85 : vector<8x128xf32>
    %88 = math.tanh %87 : vector<8x128xf32>
    %cst_38 = arith.constant 5.000000e-01 : f32
    %89 = vector.broadcast %cst_38 : f32 to vector<8x128xf32>
    %90 = arith.mulf %89, %88 : vector<8x128xf32>
    %cst_39 = arith.constant 5.000000e-01 : f32
    %91 = vector.broadcast %cst_39 : f32 to vector<8x128xf32>
    %92 = arith.addf %90, %91 : vector<8x128xf32>
    %93 = vector.extract_strided_slice %84 {offsets = [0, 128], sizes = [8, 128], strides = [1, 1]} : vector<8x512xf32> to vector<8x128xf32>
    %cst_40 = arith.constant 5.000000e-01 : f32
    %94 = vector.broadcast %cst_40 : f32 to vector<8x128xf32>
    %95 = arith.mulf %94, %93 : vector<8x128xf32>
    %96 = math.tanh %95 : vector<8x128xf32>
    %cst_41 = arith.constant 5.000000e-01 : f32
    %97 = vector.broadcast %cst_41 : f32 to vector<8x128xf32>
    %98 = arith.mulf %97, %96 : vector<8x128xf32>
    %cst_42 = arith.constant 5.000000e-01 : f32
    %99 = vector.broadcast %cst_42 : f32 to vector<8x128xf32>
    %100 = arith.addf %98, %99 : vector<8x128xf32>
    %101 = vector.extract_strided_slice %84 {offsets = [0, 256], sizes = [8, 128], strides = [1, 1]} : vector<8x512xf32> to vector<8x128xf32>
    %102 = math.tanh %101 : vector<8x128xf32>
    %103 = vector.extract_strided_slice %84 {offsets = [0, 384], sizes = [8, 128], strides = [1, 1]} : vector<8x512xf32> to vector<8x128xf32>
    %cst_43 = arith.constant 5.000000e-01 : f32
    %104 = vector.broadcast %cst_43 : f32 to vector<8x128xf32>
    %105 = arith.mulf %104, %103 : vector<8x128xf32>
    %106 = math.tanh %105 : vector<8x128xf32>
    %cst_44 = arith.constant 5.000000e-01 : f32
    %107 = vector.broadcast %cst_44 : f32 to vector<8x128xf32>
    %108 = arith.mulf %107, %106 : vector<8x128xf32>
    %cst_45 = arith.constant 5.000000e-01 : f32
    %109 = vector.broadcast %cst_45 : f32 to vector<8x128xf32>
    %110 = arith.addf %108, %109 : vector<8x128xf32>
    %111 = arith.mulf %100, %76 : vector<8x128xf32>
    %112 = arith.mulf %92, %102 : vector<8x128xf32>
    %113 = arith.addf %111, %112 : vector<8x128xf32>
    %114 = math.tanh %113 : vector<8x128xf32>
    %115 = arith.mulf %110, %114 : vector<8x128xf32>
    %c3_i32 = arith.constant 3 : i32
    %116 = arith.index_cast %c3_i32 : i32 to index
    %c0_46 = arith.constant 0 : index
    %c0_47 = arith.constant 0 : index
    %117 = vector.load %arg2[%116, %c0_46, %c0_47] : memref<8x8x512xf32, #tpu.memory_space<vmem>>, vector<1x8x512xf32>
    %118 = vector.shape_cast %117 : vector<1x8x512xf32> to vector<8x512xf32>
    %c0_48 = arith.constant 0 : index
    %c0_49 = arith.constant 0 : index
    %119 = vector.load %arg3[%c0_48, %c0_49] : memref<128x512xf32, #tpu.memory_space<vmem>>, vector<128x512xf32>
    %cst_50 = arith.constant dense<0.000000e+00> : vector<8x512xf32>
    %120 = tpu.matmul %115, %119, %cst_50 {dimension_numbers = #tpu.dot_dimension_numbers<[1], [0], [0], [1], [0, 0, 1, 1], [], []>} : vector<8x128xf32>, vector<128x512xf32>, vector<8x512xf32> -> vector<8x512xf32>
    %121 = arith.addf %118, %120 : vector<8x512xf32>
    %122 = vector.extract_strided_slice %121 {offsets = [0, 0], sizes = [8, 128], strides = [1, 1]} : vector<8x512xf32> to vector<8x128xf32>
    %cst_51 = arith.constant 5.000000e-01 : f32
    %123 = vector.broadcast %cst_51 : f32 to vector<8x128xf32>
    %124 = arith.mulf %123, %122 : vector<8x128xf32>
    %125 = math.tanh %124 : vector<8x128xf32>
    %cst_52 = arith.constant 5.000000e-01 : f32
    %126 = vector.broadcast %cst_52 : f32 to vector<8x128xf32>
    %127 = arith.mulf %126, %125 : vector<8x128xf32>
    %cst_53 = arith.constant 5.000000e-01 : f32
    %128 = vector.broadcast %cst_53 : f32 to vector<8x128xf32>
    %129 = arith.addf %127, %128 : vector<8x128xf32>
    %130 = vector.extract_strided_slice %121 {offsets = [0, 128], sizes = [8, 128], strides = [1, 1]} : vector<8x512xf32> to vector<8x128xf32>
    %cst_54 = arith.constant 5.000000e-01 : f32
    %131 = vector.broadcast %cst_54 : f32 to vector<8x128xf32>
    %132 = arith.mulf %131, %130 : vector<8x128xf32>
    %133 = math.tanh %132 : vector<8x128xf32>
    %cst_55 = arith.constant 5.000000e-01 : f32
    %134 = vector.broadcast %cst_55 : f32 to vector<8x128xf32>
    %135 = arith.mulf %134, %133 : vector<8x128xf32>
    %cst_56 = arith.constant 5.000000e-01 : f32
    %136 = vector.broadcast %cst_56 : f32 to vector<8x128xf32>
    %137 = arith.addf %135, %136 : vector<8x128xf32>
    %138 = vector.extract_strided_slice %121 {offsets = [0, 256], sizes = [8, 128], strides = [1, 1]} : vector<8x512xf32> to vector<8x128xf32>
    %139 = math.tanh %138 : vector<8x128xf32>
    %140 = vector.extract_strided_slice %121 {offsets = [0, 384], sizes = [8, 128], strides = [1, 1]} : vector<8x512xf32> to vector<8x128xf32>
    %cst_57 = arith.constant 5.000000e-01 : f32
    %141 = vector.broadcast %cst_57 : f32 to vector<8x128xf32>
    %142 = arith.mulf %141, %140 : vector<8x128xf32>
    %143 = math.tanh %142 : vector<8x128xf32>
    %cst_58 = arith.constant 5.000000e-01 : f32
    %144 = vector.broadcast %cst_58 : f32 to vector<8x128xf32>
    %145 = arith.mulf %144, %143 : vector<8x128xf32>
    %cst_59 = arith.constant 5.000000e-01 : f32
    %146 = vector.broadcast %cst_59 : f32 to vector<8x128xf32>
    %147 = arith.addf %145, %146 : vector<8x128xf32>
    %148 = arith.mulf %137, %113 : vector<8x128xf32>
    %149 = arith.mulf %129, %139 : vector<8x128xf32>
    %150 = arith.addf %148, %149 : vector<8x128xf32>
    %151 = math.tanh %150 : vector<8x128xf32>
    %152 = arith.mulf %147, %151 : vector<8x128xf32>
    %c4_i32 = arith.constant 4 : i32
    %153 = arith.index_cast %c4_i32 : i32 to index
    %c0_60 = arith.constant 0 : index
    %c0_61 = arith.constant 0 : index
    %154 = vector.load %arg2[%153, %c0_60, %c0_61] : memref<8x8x512xf32, #tpu.memory_space<vmem>>, vector<1x8x512xf32>
    %155 = vector.shape_cast %154 : vector<1x8x512xf32> to vector<8x512xf32>
    %c0_62 = arith.constant 0 : index
    %c0_63 = arith.constant 0 : index
    %156 = vector.load %arg3[%c0_62, %c0_63] : memref<128x512xf32, #tpu.memory_space<vmem>>, vector<128x512xf32>
    %cst_64 = arith.constant dense<0.000000e+00> : vector<8x512xf32>
    %157 = tpu.matmul %152, %156, %cst_64 {dimension_numbers = #tpu.dot_dimension_numbers<[1], [0], [0], [1], [0, 0, 1, 1], [], []>} : vector<8x128xf32>, vector<128x512xf32>, vector<8x512xf32> -> vector<8x512xf32>
    %158 = arith.addf %155, %157 : vector<8x512xf32>
    %159 = vector.extract_strided_slice %158 {offsets = [0, 0], sizes = [8, 128], strides = [1, 1]} : vector<8x512xf32> to vector<8x128xf32>
    %cst_65 = arith.constant 5.000000e-01 : f32
    %160 = vector.broadcast %cst_65 : f32 to vector<8x128xf32>
    %161 = arith.mulf %160, %159 : vector<8x128xf32>
    %162 = math.tanh %161 : vector<8x128xf32>
    %cst_66 = arith.constant 5.000000e-01 : f32
    %163 = vector.broadcast %cst_66 : f32 to vector<8x128xf32>
    %164 = arith.mulf %163, %162 : vector<8x128xf32>
    %cst_67 = arith.constant 5.000000e-01 : f32
    %165 = vector.broadcast %cst_67 : f32 to vector<8x128xf32>
    %166 = arith.addf %164, %165 : vector<8x128xf32>
    %167 = vector.extract_strided_slice %158 {offsets = [0, 128], sizes = [8, 128], strides = [1, 1]} : vector<8x512xf32> to vector<8x128xf32>
    %cst_68 = arith.constant 5.000000e-01 : f32
    %168 = vector.broadcast %cst_68 : f32 to vector<8x128xf32>
    %169 = arith.mulf %168, %167 : vector<8x128xf32>
    %170 = math.tanh %169 : vector<8x128xf32>
    %cst_69 = arith.constant 5.000000e-01 : f32
    %171 = vector.broadcast %cst_69 : f32 to vector<8x128xf32>
    %172 = arith.mulf %171, %170 : vector<8x128xf32>
    %cst_70 = arith.constant 5.000000e-01 : f32
    %173 = vector.broadcast %cst_70 : f32 to vector<8x128xf32>
    %174 = arith.addf %172, %173 : vector<8x128xf32>
    %175 = vector.extract_strided_slice %158 {offsets = [0, 256], sizes = [8, 128], strides = [1, 1]} : vector<8x512xf32> to vector<8x128xf32>
    %176 = math.tanh %175 : vector<8x128xf32>
    %177 = vector.extract_strided_slice %158 {offsets = [0, 384], sizes = [8, 128], strides = [1, 1]} : vector<8x512xf32> to vector<8x128xf32>
    %cst_71 = arith.constant 5.000000e-01 : f32
    %178 = vector.broadcast %cst_71 : f32 to vector<8x128xf32>
    %179 = arith.mulf %178, %177 : vector<8x128xf32>
    %180 = math.tanh %179 : vector<8x128xf32>
    %cst_72 = arith.constant 5.000000e-01 : f32
    %181 = vector.broadcast %cst_72 : f32 to vector<8x128xf32>
    %182 = arith.mulf %181, %180 : vector<8x128xf32>
    %cst_73 = arith.constant 5.000000e-01 : f32
    %183 = vector.broadcast %cst_73 : f32 to vector<8x128xf32>
    %184 = arith.addf %182, %183 : vector<8x128xf32>
    %185 = arith.mulf %174, %150 : vector<8x128xf32>
    %186 = arith.mulf %166, %176 : vector<8x128xf32>
    %187 = arith.addf %185, %186 : vector<8x128xf32>
    %188 = math.tanh %187 : vector<8x128xf32>
    %189 = arith.mulf %184, %188 : vector<8x128xf32>
    %c5_i32 = arith.constant 5 : i32
    %190 = arith.index_cast %c5_i32 : i32 to index
    %c0_74 = arith.constant 0 : index
    %c0_75 = arith.constant 0 : index
    %191 = vector.load %arg2[%190, %c0_74, %c0_75] : memref<8x8x512xf32, #tpu.memory_space<vmem>>, vector<1x8x512xf32>
    %192 = vector.shape_cast %191 : vector<1x8x512xf32> to vector<8x512xf32>
    %c0_76 = arith.constant 0 : index
    %c0_77 = arith.constant 0 : index
    %193 = vector.load %arg3[%c0_76, %c0_77] : memref<128x512xf32, #tpu.memory_space<vmem>>, vector<128x512xf32>
    %cst_78 = arith.constant dense<0.000000e+00> : vector<8x512xf32>
    %194 = tpu.matmul %189, %193, %cst_78 {dimension_numbers = #tpu.dot_dimension_numbers<[1], [0], [0], [1], [0, 0, 1, 1], [], []>} : vector<8x128xf32>, vector<128x512xf32>, vector<8x512xf32> -> vector<8x512xf32>
    %195 = arith.addf %192, %194 : vector<8x512xf32>
    %196 = vector.extract_strided_slice %195 {offsets = [0, 0], sizes = [8, 128], strides = [1, 1]} : vector<8x512xf32> to vector<8x128xf32>
    %cst_79 = arith.constant 5.000000e-01 : f32
    %197 = vector.broadcast %cst_79 : f32 to vector<8x128xf32>
    %198 = arith.mulf %197, %196 : vector<8x128xf32>
    %199 = math.tanh %198 : vector<8x128xf32>
    %cst_80 = arith.constant 5.000000e-01 : f32
    %200 = vector.broadcast %cst_80 : f32 to vector<8x128xf32>
    %201 = arith.mulf %200, %199 : vector<8x128xf32>
    %cst_81 = arith.constant 5.000000e-01 : f32
    %202 = vector.broadcast %cst_81 : f32 to vector<8x128xf32>
    %203 = arith.addf %201, %202 : vector<8x128xf32>
    %204 = vector.extract_strided_slice %195 {offsets = [0, 128], sizes = [8, 128], strides = [1, 1]} : vector<8x512xf32> to vector<8x128xf32>
    %cst_82 = arith.constant 5.000000e-01 : f32
    %205 = vector.broadcast %cst_82 : f32 to vector<8x128xf32>
    %206 = arith.mulf %205, %204 : vector<8x128xf32>
    %207 = math.tanh %206 : vector<8x128xf32>
    %cst_83 = arith.constant 5.000000e-01 : f32
    %208 = vector.broadcast %cst_83 : f32 to vector<8x128xf32>
    %209 = arith.mulf %208, %207 : vector<8x128xf32>
    %cst_84 = arith.constant 5.000000e-01 : f32
    %210 = vector.broadcast %cst_84 : f32 to vector<8x128xf32>
    %211 = arith.addf %209, %210 : vector<8x128xf32>
    %212 = vector.extract_strided_slice %195 {offsets = [0, 256], sizes = [8, 128], strides = [1, 1]} : vector<8x512xf32> to vector<8x128xf32>
    %213 = math.tanh %212 : vector<8x128xf32>
    %214 = vector.extract_strided_slice %195 {offsets = [0, 384], sizes = [8, 128], strides = [1, 1]} : vector<8x512xf32> to vector<8x128xf32>
    %cst_85 = arith.constant 5.000000e-01 : f32
    %215 = vector.broadcast %cst_85 : f32 to vector<8x128xf32>
    %216 = arith.mulf %215, %214 : vector<8x128xf32>
    %217 = math.tanh %216 : vector<8x128xf32>
    %cst_86 = arith.constant 5.000000e-01 : f32
    %218 = vector.broadcast %cst_86 : f32 to vector<8x128xf32>
    %219 = arith.mulf %218, %217 : vector<8x128xf32>
    %cst_87 = arith.constant 5.000000e-01 : f32
    %220 = vector.broadcast %cst_87 : f32 to vector<8x128xf32>
    %221 = arith.addf %219, %220 : vector<8x128xf32>
    %222 = arith.mulf %211, %187 : vector<8x128xf32>
    %223 = arith.mulf %203, %213 : vector<8x128xf32>
    %224 = arith.addf %222, %223 : vector<8x128xf32>
    %225 = math.tanh %224 : vector<8x128xf32>
    %226 = arith.mulf %221, %225 : vector<8x128xf32>
    %c6_i32 = arith.constant 6 : i32
    %227 = arith.index_cast %c6_i32 : i32 to index
    %c0_88 = arith.constant 0 : index
    %c0_89 = arith.constant 0 : index
    %228 = vector.load %arg2[%227, %c0_88, %c0_89] : memref<8x8x512xf32, #tpu.memory_space<vmem>>, vector<1x8x512xf32>
    %229 = vector.shape_cast %228 : vector<1x8x512xf32> to vector<8x512xf32>
    %c0_90 = arith.constant 0 : index
    %c0_91 = arith.constant 0 : index
    %230 = vector.load %arg3[%c0_90, %c0_91] : memref<128x512xf32, #tpu.memory_space<vmem>>, vector<128x512xf32>
    %cst_92 = arith.constant dense<0.000000e+00> : vector<8x512xf32>
    %231 = tpu.matmul %226, %230, %cst_92 {dimension_numbers = #tpu.dot_dimension_numbers<[1], [0], [0], [1], [0, 0, 1, 1], [], []>} : vector<8x128xf32>, vector<128x512xf32>, vector<8x512xf32> -> vector<8x512xf32>
    %232 = arith.addf %229, %231 : vector<8x512xf32>
    %233 = vector.extract_strided_slice %232 {offsets = [0, 0], sizes = [8, 128], strides = [1, 1]} : vector<8x512xf32> to vector<8x128xf32>
    %cst_93 = arith.constant 5.000000e-01 : f32
    %234 = vector.broadcast %cst_93 : f32 to vector<8x128xf32>
    %235 = arith.mulf %234, %233 : vector<8x128xf32>
    %236 = math.tanh %235 : vector<8x128xf32>
    %cst_94 = arith.constant 5.000000e-01 : f32
    %237 = vector.broadcast %cst_94 : f32 to vector<8x128xf32>
    %238 = arith.mulf %237, %236 : vector<8x128xf32>
    %cst_95 = arith.constant 5.000000e-01 : f32
    %239 = vector.broadcast %cst_95 : f32 to vector<8x128xf32>
    %240 = arith.addf %238, %239 : vector<8x128xf32>
    %241 = vector.extract_strided_slice %232 {offsets = [0, 128], sizes = [8, 128], strides = [1, 1]} : vector<8x512xf32> to vector<8x128xf32>
    %cst_96 = arith.constant 5.000000e-01 : f32
    %242 = vector.broadcast %cst_96 : f32 to vector<8x128xf32>
    %243 = arith.mulf %242, %241 : vector<8x128xf32>
    %244 = math.tanh %243 : vector<8x128xf32>
    %cst_97 = arith.constant 5.000000e-01 : f32
    %245 = vector.broadcast %cst_97 : f32 to vector<8x128xf32>
    %246 = arith.mulf %245, %244 : vector<8x128xf32>
    %cst_98 = arith.constant 5.000000e-01 : f32
    %247 = vector.broadcast %cst_98 : f32 to vector<8x128xf32>
    %248 = arith.addf %246, %247 : vector<8x128xf32>
    %249 = vector.extract_strided_slice %232 {offsets = [0, 256], sizes = [8, 128], strides = [1, 1]} : vector<8x512xf32> to vector<8x128xf32>
    %250 = math.tanh %249 : vector<8x128xf32>
    %251 = vector.extract_strided_slice %232 {offsets = [0, 384], sizes = [8, 128], strides = [1, 1]} : vector<8x512xf32> to vector<8x128xf32>
    %cst_99 = arith.constant 5.000000e-01 : f32
    %252 = vector.broadcast %cst_99 : f32 to vector<8x128xf32>
    %253 = arith.mulf %252, %251 : vector<8x128xf32>
    %254 = math.tanh %253 : vector<8x128xf32>
    %cst_100 = arith.constant 5.000000e-01 : f32
    %255 = vector.broadcast %cst_100 : f32 to vector<8x128xf32>
    %256 = arith.mulf %255, %254 : vector<8x128xf32>
    %cst_101 = arith.constant 5.000000e-01 : f32
    %257 = vector.broadcast %cst_101 : f32 to vector<8x128xf32>
    %258 = arith.addf %256, %257 : vector<8x128xf32>
    %259 = arith.mulf %248, %224 : vector<8x128xf32>
    %260 = arith.mulf %240, %250 : vector<8x128xf32>
    %261 = arith.addf %259, %260 : vector<8x128xf32>
    %262 = math.tanh %261 : vector<8x128xf32>
    %263 = arith.mulf %258, %262 : vector<8x128xf32>
    %c7_i32 = arith.constant 7 : i32
    %264 = arith.index_cast %c7_i32 : i32 to index
    %c0_102 = arith.constant 0 : index
    %c0_103 = arith.constant 0 : index
    %265 = vector.load %arg2[%264, %c0_102, %c0_103] : memref<8x8x512xf32, #tpu.memory_space<vmem>>, vector<1x8x512xf32>
    %266 = vector.shape_cast %265 : vector<1x8x512xf32> to vector<8x512xf32>
    %c0_104 = arith.constant 0 : index
    %c0_105 = arith.constant 0 : index
    %267 = vector.load %arg3[%c0_104, %c0_105] : memref<128x512xf32, #tpu.memory_space<vmem>>, vector<128x512xf32>
    %cst_106 = arith.constant dense<0.000000e+00> : vector<8x512xf32>
    %268 = tpu.matmul %263, %267, %cst_106 {dimension_numbers = #tpu.dot_dimension_numbers<[1], [0], [0], [1], [0, 0, 1, 1], [], []>} : vector<8x128xf32>, vector<128x512xf32>, vector<8x512xf32> -> vector<8x512xf32>
    %269 = arith.addf %266, %268 : vector<8x512xf32>
    %270 = vector.extract_strided_slice %269 {offsets = [0, 0], sizes = [8, 128], strides = [1, 1]} : vector<8x512xf32> to vector<8x128xf32>
    %cst_107 = arith.constant 5.000000e-01 : f32
    %271 = vector.broadcast %cst_107 : f32 to vector<8x128xf32>
    %272 = arith.mulf %271, %270 : vector<8x128xf32>
    %273 = math.tanh %272 : vector<8x128xf32>
    %cst_108 = arith.constant 5.000000e-01 : f32
    %274 = vector.broadcast %cst_108 : f32 to vector<8x128xf32>
    %275 = arith.mulf %274, %273 : vector<8x128xf32>
    %cst_109 = arith.constant 5.000000e-01 : f32
    %276 = vector.broadcast %cst_109 : f32 to vector<8x128xf32>
    %277 = arith.addf %275, %276 : vector<8x128xf32>
    %278 = vector.extract_strided_slice %269 {offsets = [0, 128], sizes = [8, 128], strides = [1, 1]} : vector<8x512xf32> to vector<8x128xf32>
    %cst_110 = arith.constant 5.000000e-01 : f32
    %279 = vector.broadcast %cst_110 : f32 to vector<8x128xf32>
    %280 = arith.mulf %279, %278 : vector<8x128xf32>
    %281 = math.tanh %280 : vector<8x128xf32>
    %cst_111 = arith.constant 5.000000e-01 : f32
    %282 = vector.broadcast %cst_111 : f32 to vector<8x128xf32>
    %283 = arith.mulf %282, %281 : vector<8x128xf32>
    %cst_112 = arith.constant 5.000000e-01 : f32
    %284 = vector.broadcast %cst_112 : f32 to vector<8x128xf32>
    %285 = arith.addf %283, %284 : vector<8x128xf32>
    %286 = vector.extract_strided_slice %269 {offsets = [0, 256], sizes = [8, 128], strides = [1, 1]} : vector<8x512xf32> to vector<8x128xf32>
    %287 = math.tanh %286 : vector<8x128xf32>
    %288 = vector.extract_strided_slice %269 {offsets = [0, 384], sizes = [8, 128], strides = [1, 1]} : vector<8x512xf32> to vector<8x128xf32>
    %cst_113 = arith.constant 5.000000e-01 : f32
    %289 = vector.broadcast %cst_113 : f32 to vector<8x128xf32>
    %290 = arith.mulf %289, %288 : vector<8x128xf32>
    %291 = math.tanh %290 : vector<8x128xf32>
    %cst_114 = arith.constant 5.000000e-01 : f32
    %292 = vector.broadcast %cst_114 : f32 to vector<8x128xf32>
    %293 = arith.mulf %292, %291 : vector<8x128xf32>
    %cst_115 = arith.constant 5.000000e-01 : f32
    %294 = vector.broadcast %cst_115 : f32 to vector<8x128xf32>
    %295 = arith.addf %293, %294 : vector<8x128xf32>
    %296 = arith.mulf %285, %261 : vector<8x128xf32>
    %297 = arith.mulf %277, %287 : vector<8x128xf32>
    %298 = arith.addf %296, %297 : vector<8x128xf32>
    %299 = math.tanh %298 : vector<8x128xf32>
    %300 = arith.mulf %295, %299 : vector<8x128xf32>
    %c8_i32 = arith.constant 8 : i32
    %c0_116 = arith.constant 0 : index
    %c0_117 = arith.constant 0 : index
    %301 = vector.load %arg7[%c0_116, %c0_117] : memref<8x128xf32, #tpu.memory_space<vmem>>, vector<8x128xf32>
    tpu.vector_store %arg7[%c0_116, %c0_117], %300 {strides = array<i32>} : memref<8x128xf32, #tpu.memory_space<vmem>>, vector<8x128xf32>,
    %c0_118 = arith.constant 0 : index
    %c0_119 = arith.constant 0 : index
    %302 = vector.load %arg8[%c0_118, %c0_119] : memref<8x128xf32, #tpu.memory_space<vmem>>, vector<8x128xf32>
    tpu.vector_store %arg8[%c0_118, %c0_119], %298 {strides = array<i32>} : memref<8x128xf32, #tpu.memory_space<vmem>>, vector<8x128xf32>,
    %c0_i32_120 = arith.constant 0 : i32
    %303 = arith.cmpi eq, %arg1, %c0_i32_120 : i32
    %304 = arith.extui %303 : i1 to i32
    %c0_i32_121 = arith.constant 0 : i32
    %305 = arith.cmpi ne, %304, %c0_i32_121 : i32
    scf.if %305 {
      %c0_122 = arith.constant 0 : index
      %c0_123 = arith.constant 0 : index
      %306 = vector.load %arg4[%c0_122, %c0_123] : memref<128x128xf32, #tpu.memory_space<vmem>>, vector<128x128xf32>
      %cst_124 = arith.constant dense<0.000000e+00> : vector<8x128xf32>
      %307 = tpu.matmul %300, %306, %cst_124 {dimension_numbers = #tpu.dot_dimension_numbers<[1], [0], [0], [1], [0, 0, 1, 1], [], []>} : vector<8x128xf32>, vector<128x128xf32>, vector<8x128xf32> -> vector<8x128xf32>
      %c0_125 = arith.constant 0 : index
      %c0_126 = arith.constant 0 : index
      %308 = vector.load %arg5[%c0_125, %c0_126] : memref<1x128xf32, #tpu.memory_space<vmem>>, vector<1x128xf32>
      %309 = vector.broadcast %308 : vector<1x128xf32> to vector<8x128xf32>
      %310 = arith.addf %307, %309 : vector<8x128xf32>
      %c0_127 = arith.constant 0 : index
      %c0_128 = arith.constant 0 : index
      %311 = vector.load %arg6[%c0_127, %c0_128] : memref<8x128xf32, #tpu.memory_space<vmem>>, vector<8x128xf32>
      tpu.vector_store %arg6[%c0_127, %c0_128], %310 {strides = array<i32>} : memref<8x128xf32, #tpu.memory_space<vmem>>, vector<8x128xf32>,
    } else {
    }
    return
  }
  func.func @transform_0(%arg0: i32, %arg1: i32) -> (i32, i32, i32) {
    %c0_i32 = arith.constant 0 : i32
    %c0_i32_0 = arith.constant 0 : i32
    return %arg1, %arg0, %c0_i32 : i32, i32, i32
  }
  func.func @transform_1(%arg0: i32, %arg1: i32) -> (i32, i32) {
    %c0_i32 = arith.constant 0 : i32
    %c0_i32_0 = arith.constant 0 : i32
    %c0_i32_1 = arith.constant 0 : i32
    return %c0_i32, %c0_i32_0 : i32, i32
  }
  func.func @transform_2(%arg0: i32, %arg1: i32) -> (i32, i32) {
    %c0_i32 = arith.constant 0 : i32
    %c0_i32_0 = arith.constant 0 : i32
    %c0_i32_1 = arith.constant 0 : i32
    return %c0_i32, %c0_i32_0 : i32, i32
  }
  func.func @transform_3(%arg0: i32, %arg1: i32) -> (i32, i32) {
    %c0_i32 = arith.constant 0 : i32
    %c0_i32_0 = arith.constant 0 : i32
    %c0_i32_1 = arith.constant 0 : i32
    return %c0_i32, %c0_i32_0 : i32, i32
  }
  func.func @transform_4(%arg0: i32, %arg1: i32) -> (i32, i32) {
    %c0_i32 = arith.constant 0 : i32
    %c0_i32_0 = arith.constant 0 : i32
    return %arg0, %c0_i32 : i32, i32
  }
}

</mosaic_0001>

<bundles_post_ra>
// kernel: energy_lstm_forward.1
= control target key start
LH: loop header
LB: loop body
LE: loop exit
PB: predicated region body
PF: predicated region fallthrough
CT: control target
= control target key end

     0   :  { %v2243_v3 = vmov 0.0   ;;  %vm2245_vm0 = vmmov 0   ;;  %s2980_s1 = inlined_call_operand.vmem [shape: f32[128,512], index: 1, kind: input, shape index: {}]   ;;  %s2981_s0 = inlined_call_operand.vmem [shape: f32[8,8,512], index: 0, kind: input, shape index: {}]   ;;  %s2982_s2 = inlined_call_operand.vmem [shape: f32[128,128], index: 2, kind: input, shape index: {}]   ;;  %s2983_s3 = inlined_call_operand.vmem [shape: f32[1,128], index: 3, kind: input, shape index: {}]   ;;  %s2984_s4 = inlined_call_operand.vmem [shape: f32[8,128], index: 4, kind: output, shape index: {}]  }
   0x1   :  { %v30_v0 = vld [vmem:[%s2980_s1 + $0x8] sm:$0xff]  ;;  %v29_v2 = vld [vmem:[%s2980_s1] sm:$0xff]  ;;  %157 = vmatprep.mubr.f32.mxu0 %v2243_v3  ;;  %228 = vmatprep.mubr.f32.mxu1 %v2243_v3  ;;  %v32_v12 = vld [vmem:[%s2980_s1 + $0x18] sm:$0xff] }
   0x2   :  { %v34_v1 = vld [vmem:[%s2980_s1 + $0x28] sm:$0xff]  ;;  %v33_v5 = vld [vmem:[%s2980_s1 + $0x20] sm:$0xff]  ;;  %v36_v13 = vld [vmem:[%s2980_s1 + $0x38] sm:$0xff] }
   0x3   :  { %v2282_v4 = vpack.c.bf16 %v34_v1, %v30_v0  ;;  %v38_v6 = vld [vmem:[%s2980_s1 + $0x48] sm:$0xff]  ;;  %v2293_v8 = vpack.c.bf16 %v33_v5, %v29_v2  ;;  %v37_v10 = vld [vmem:[%s2980_s1 + $0x40] sm:$0xff]  ;;  %v31_v14 = vld [vmem:[%s2980_s1 + $0x10] sm:$0xff]  ;;  %v2319_v17 = vpack.c.bf16 %v36_v13, %v32_v12 }
   0x4   :  { %v42_v7 = vld [vmem:[%s2980_s1 + $0x68] sm:$0xff]  ;;  %v41_v11 = vld [vmem:[%s2980_s1 + $0x60] sm:$0xff]  ;;  %v35_v15 = vld [vmem:[%s2980_s1 + $0x30] sm:$0xff] }
   0x5   :  { %v2295_v9 = vpack.c.bf16 %v42_v7, %v38_v6  ;;  %1625 = vmatprep.subr.bf16.mxu0 %v2282_v4  ;;  %v2317_v16 = vpack.c.bf16 %v41_v11, %v37_v10  ;;  %v2321_v18 = vpack.c.bf16 %v35_v15, %v31_v14  ;;  %v46_v19 = vld [vmem:[%s2980_s1 + $0x88] sm:$0xff]  ;;  %v45_v21 = vld [vmem:[%s2980_s1 + $0x80] sm:$0xff]  ;;  %v40_v24 = vld [vmem:[%s2980_s1 + $0x58] sm:$0xff]  ;;  %1657 = vmatprep.subr.bf16.mxu1 %v2319_v17 }
   0x6   :  { %1627 = vmatpush1.bf16.msra.mxu0 %v2293_v8  ;;  %v50_v20 = vld [vmem:[%s2980_s1 + $0xa8] sm:$0xff]  ;;  %v49_v23 = vld [vmem:[%s2980_s1 + $0xa0] sm:$0xff]  ;;  %v44_v25 = vld [vmem:[%s2980_s1 + $0x78] sm:$0xff] }
   0x7   :  { %1629 = vmatprep.subr.bf16.mxu0 %v2295_v9  ;;  %v2333_v22 = vpack.c.bf16 %v50_v20, %v46_v19  ;;  %v2345_v26 = vpack.c.bf16 %v44_v25, %v40_v24  ;;  %v39_v27 = vld [vmem:[%s2980_s1 + $0x50] sm:$0xff]  ;;  %v54_v29 = vld [vmem:[%s2980_s1 + $0xc8] sm:$0xff]  ;;  %1659 = vmatpush1.bf16.msra.mxu1 %v2321_v18  ;;  %v2363_v32 = vpack.c.bf16 %v49_v23, %v45_v21  ;;  %v48_v33 = vld [vmem:[%s2980_s1 + $0x98] sm:$0xff] }
   0x8   :  { %v43_v28 = vld [vmem:[%s2980_s1 + $0x70] sm:$0xff]  ;;  %v58_v31 = vld [vmem:[%s2980_s1 + $0xe8] sm:$0xff]  ;;  %v52_v34 = vld [vmem:[%s2980_s1 + $0xb8] sm:$0xff] }
   0x9   :  { %v2357_v30 = vpack.c.bf16 %v43_v28, %v39_v27  ;;  %1661 = vmatprep.subr.bf16.mxu1 %v2345_v26  ;;  %v47_v35 = vld [vmem:[%s2980_s1 + $0x90] sm:$0xff]  ;;  %v2376_v36 = vpack.c.bf16 %v58_v31, %v54_v29  ;;  %v53_v37 = vld [vmem:[%s2980_s1 + $0xc0] sm:$0xff]  ;;  %v2384_v39 = vpack.c.bf16 %v52_v34, %v48_v33  ;;  %v62_v41 = vld [vmem:[%s2980_s1 + $0x108] sm:$0xff] }
   0xa   :  { %1631 = vmatpush1.bf16.msra.mxu0 %v2317_v16  ;;  %v57_v38 = vld [vmem:[%s2980_s1 + $0xe0] sm:$0xff]  ;;  %v51_v40 = vld [vmem:[%s2980_s1 + $0xb0] sm:$0xff]  ;;  %v66_v42 = vld [vmem:[%s2980_s1 + $0x128] sm:$0xff] }
   0xb   :  { %1633 = vmatprep.subr.bf16.mxu0 %v2333_v22  ;;  %v56_v43 = vld [vmem:[%s2980_s1 + $0xd8] sm:$0xff]  ;;  %1663 = vmatpush1.bf16.msra.mxu1 %v2357_v30  ;;  %v2399_v44 = vpack.c.bf16 %v51_v40, %v47_v35  ;;  %v2405_v46 = vpack.c.bf16 %v57_v38, %v53_v37  ;;  %v61_v47 = vld [vmem:[%s2980_s1 + $0x100] sm:$0xff]  ;;  %v55_v49 = vld [vmem:[%s2980_s1 + $0xd0] sm:$0xff]  ;;  %v2420_v51 = vpack.c.bf16 %v66_v42, %v62_v41 }
   0xc   :  { %v60_v45 = vld [vmem:[%s2980_s1 + $0xf8] sm:$0xff]  ;;  %1665 = vmatprep.subr.bf16.mxu1 %v2384_v39  ;;  %v59_v50 = vld [vmem:[%s2980_s1 + $0xf0] sm:$0xff]  ;;  %v65_v52 = vld [vmem:[%s2980_s1 + $0x120] sm:$0xff] }
   0xd   :  { %v2411_v48 = vpack.c.bf16 %v60_v45, %v56_v43  ;;  %v64_v53 = vld [vmem:[%s2980_s1 + $0x118] sm:$0xff]  ;;  %v70_v55 = vld [vmem:[%s2980_s1 + $0x148] sm:$0xff]  ;;  %v2438_v57 = vpack.c.bf16 %v59_v50, %v55_v49  ;;  %v2441_v58 = vpack.c.bf16 %v65_v52, %v61_v47  ;;  %v69_v59 = vld [vmem:[%s2980_s1 + $0x140] sm:$0xff] }
   0xe   :  { %1635 = vmatpush1.bf16.msra.mxu0 %v2363_v32  ;;  %v68_v54 = vld [vmem:[%s2980_s1 + $0x138] sm:$0xff]  ;;  %v74_v56 = vld [vmem:[%s2980_s1 + $0x168] sm:$0xff]  ;;  %v63_v61 = vld [vmem:[%s2980_s1 + $0x110] sm:$0xff] }
   0xf   :  { %1637 = vmatprep.subr.bf16.mxu0 %v2376_v36  ;;  %1667 = vmatpush1.bf16.msra.mxu1 %v2399_v44  ;;  %v2447_v60 = vpack.c.bf16 %v68_v54, %v64_v53  ;;  %v67_v62 = vld [vmem:[%s2980_s1 + $0x130] sm:$0xff]  ;;  %v2456_v63 = vpack.c.bf16 %v74_v56, %v70_v55  ;;  %v73_v0 = vld [vmem:[%s2980_s1 + $0x160] sm:$0xff]  ;;  %v72_v1 = vld [vmem:[%s2980_s1 + $0x158] sm:$0xff] }
  0x10   :  { %1669 = vmatprep.subr.bf16.mxu1 %v2411_v48  ;;  %v76_v2 = vld [vmem:[%s2980_s1 + $0x178] sm:$0xff]  ;;  %v78_v5 = vld [vmem:[%s2980_s1 + $0x188] sm:$0xff]  ;;  %v2474_v7 = vpack.c.bf16 %v67_v62, %v63_v61  ;;  %v2477_v10 = vpack.c.bf16 %v73_v0, %v69_v59  ;;  %v77_v11 = vld [vmem:[%s2980_s1 + $0x180] sm:$0xff] }
  0x11   :  { %v82_v6 = vld [vmem:[%s2980_s1 + $0x1a8] sm:$0xff]  ;;  %v2483_v12 = vpack.c.bf16 %v76_v2, %v72_v1  ;;  %v71_v13 = vld [vmem:[%s2980_s1 + $0x150] sm:$0xff]  ;;  %v81_v19 = vld [vmem:[%s2980_s1 + $0x1a0] sm:$0xff] }
  0x12   :  { %1639 = vmatpush1.bf16.msra.mxu0 %v2405_v46  ;;  %v75_v14 = vld [vmem:[%s2980_s1 + $0x170] sm:$0xff]  ;;  %v2492_v15 = vpack.c.bf16 %v82_v6, %v78_v5  ;;  %v80_v20 = vld [vmem:[%s2980_s1 + $0x198] sm:$0xff]  ;;  %v86_v23 = vld [vmem:[%s2980_s1 + $0x1c8] sm:$0xff]  ;;  %v2513_v27 = vpack.c.bf16 %v81_v19, %v77_v11 }
  0x13   :  { %1641 = vmatprep.subr.bf16.mxu0 %v2420_v51  ;;  %1671 = vmatpush1.bf16.msra.mxu1 %v2438_v57  ;;  %v84_v21 = vld [vmem:[%s2980_s1 + $0x1b8] sm:$0xff]  ;;  %v90_v24 = vld [vmem:[%s2980_s1 + $0x1e8] sm:$0xff]  ;;  %v2510_v25 = vpack.c.bf16 %v75_v14, %v71_v13  ;;  %v85_v28 = vld [vmem:[%s2980_s1 + $0x1c0] sm:$0xff] }
  0x14   :  { %1673 = vmatprep.subr.bf16.mxu1 %v2447_v60  ;;  %v2519_v29 = vpack.c.bf16 %v84_v21, %v80_v20  ;;  %v79_v31 = vld [vmem:[%s2980_s1 + $0x190] sm:$0xff]  ;;  %v2528_v34 = vpack.c.bf16 %v90_v24, %v86_v23  ;;  %v89_v35 = vld [vmem:[%s2980_s1 + $0x1e0] sm:$0xff]  ;;  %v88_v37 = vld [vmem:[%s2980_s1 + $0x1d8] sm:$0xff] }
  0x15   :  { %v83_v33 = vld [vmem:[%s2980_s1 + $0x1b0] sm:$0xff]  ;;  %v92_v38 = vld [vmem:[%s2980_s1 + $0x1f8] sm:$0xff]  ;;  %v2543_v41 = vpack.c.bf16 %v89_v35, %v85_v28  ;;  %v25_v49 = vld [vmem:[%s2981_s0] sm:$0xff] }
  0x16   :  { %1643 = vmatpush1.bf16.msra.mxu0 %v2441_v58  ;;  %v2540_v40 = vpack.c.bf16 %v83_v33, %v79_v31  ;;  %v2546_v42 = vpack.c.bf16 %v92_v38, %v88_v37  ;;  %v87_v43 = vld [vmem:[%s2980_s1 + $0x1d0] sm:$0xff]  ;;  %v26_v50 = vld [vmem:[%s2981_s0 + $0x8] sm:$0xff]  ;;  %v28_v2 = vld [vmem:[%s2981_s0 + $0x18] sm:$0xff] }
  0x17   :  { %1645 = vmatprep.subr.bf16.mxu0 %v2456_v63  ;;  %1675 = vmatpush1.bf16.msra.mxu1 %v2474_v7  ;;  %v91_v45 = vld [vmem:[%s2980_s1 + $0x1f0] sm:$0xff] }
  0x18   :  { %1677 = vmatprep.subr.bf16.mxu1 %v2483_v12  ;;  %v2556_v47 = vpack.c.bf16 %v91_v45, %v87_v43  ;;  %v27_v55 = vld [vmem:[%s2981_s0 + $0x10] sm:$0xff]  ;;  %v1543_v45 = vld [vmem:[%s2981_s0 + $0x20] sm:$0xff] }
  0x1a   :  { %1647 = vmatpush1.bf16.msra.mxu0 %v2477_v10 }
  0x1b   :  { %1649 = vmatprep.subr.bf16.mxu0 %v2492_v15  ;;  %1679 = vmatpush1.bf16.msra.mxu1 %v2510_v25 }
  0x1c   :  { %1681 = vmatprep.subr.bf16.mxu1 %v2519_v29 }
  0x1e   :  { %1651 = vmatpush1.bf16.msra.mxu0 %v2513_v27 }
  0x1f   :  { %1653 = vmatprep.subr.bf16.mxu0 %v2528_v34  ;;  %1683 = vmatpush1.bf16.msra.mxu1 %v2540_v40 }
  0x20   :  { %1685 = vmatprep.subr.bf16.mxu1 %v2546_v42 }
  0x22   :  { %1655 = vmatpush1.bf16.msra.mxu0 %v2543_v41 }
  0x23   :  { %1689 = vmatprep.subr.bf16.mxu0 %v2282_v4  ;;  %1687 = vmatpush1.bf16.msra.mxu1 %v2556_v47 }
  0x24   :  { %1721 = vmatprep.subr.bf16.mxu1 %v2319_v17 }
  0x25   :  { %158 = vmatmul.mubr.f32.vlgmr.msra.gmra.mrb[0].mxu0 %v2243_v3 }
  0x26   :  { %1691 = vmatpush1.bf16.msra.mxu0 %v2293_v8  ;;  %326 = vmatprep.mubr.f32.mxu0 %v2243_v3 }
  0x27   :  { %1693 = vmatprep.subr.bf16.mxu0 %v2295_v9  ;;  %229 = vmatmul.mubr.f32.vlgmr.msra.gmra.mrb[0].mxu1 %v2243_v3 }
  0x28   :  { %1723 = vmatpush1.bf16.msra.mxu1 %v2321_v18  ;;  %397 = vmatprep.mubr.f32.mxu1 %v2243_v3 }
  0x29   :  { %1725 = vmatprep.subr.bf16.mxu1 %v2345_v26 }
  0x2a   :  { %1695 = vmatpush1.bf16.msra.mxu0 %v2317_v16 }
  0x2b   :  { %1697 = vmatprep.subr.bf16.mxu0 %v2333_v22 }
  0x2c   :  { %1727 = vmatpush1.bf16.msra.mxu1 %v2357_v30 }
  0x2d   :  { %1729 = vmatprep.subr.bf16.mxu1 %v2384_v39 }
  0x2e   :  { %1699 = vmatpush1.bf16.msra.mxu0 %v2363_v32 }
  0x2f   :  { %1701 = vmatprep.subr.bf16.mxu0 %v2376_v36 }
  0x30   :  { %1731 = vmatpush1.bf16.msra.mxu1 %v2399_v44 }
  0x31   :  { %1733 = vmatprep.subr.bf16.mxu1 %v2411_v48 }
  0x32   :  { %1703 = vmatpush1.bf16.msra.mxu0 %v2405_v46 }
  0x33   :  { %1705 = vmatprep.subr.bf16.mxu0 %v2420_v51 }
  0x34   :  { %1735 = vmatpush1.bf16.msra.mxu1 %v2438_v57 }
  0x35   :  { %1737 = vmatprep.subr.bf16.mxu1 %v2447_v60 }
  0x36   :  { %1707 = vmatpush1.bf16.msra.mxu0 %v2441_v58 }
  0x37   :  { %1709 = vmatprep.subr.bf16.mxu0 %v2456_v63 }
  0x38   :  { %1739 = vmatpush1.bf16.msra.mxu1 %v2474_v7 }
  0x39   :  { %1741 = vmatprep.subr.bf16.mxu1 %v2483_v12 }
  0x3a   :  { %1711 = vmatpush1.bf16.msra.mxu0 %v2477_v10 }
  0x3b   :  { %1713 = vmatprep.subr.bf16.mxu0 %v2492_v15 }
  0x3c   :  { %1743 = vmatpush1.bf16.msra.mxu1 %v2510_v25 }
  0x3d   :  { %1745 = vmatprep.subr.bf16.mxu1 %v2519_v29 }
  0x3e   :  { %1715 = vmatpush1.bf16.msra.mxu0 %v2513_v27 }
  0x3f   :  { %1717 = vmatprep.subr.bf16.mxu0 %v2528_v34 }
  0x40   :  { %1747 = vmatpush1.bf16.msra.mxu1 %v2540_v40 }
  0x41   :  { %1749 = vmatprep.subr.bf16.mxu1 %v2546_v42 }
  0x42   :  { %1719 = vmatpush1.bf16.msra.mxu0 %v2543_v41 }
  0x43   :  { %1753 = vmatprep.subr.bf16.mxu0 %v2282_v4 }
  0x44   :  { %1751 = vmatpush1.bf16.msra.mxu1 %v2556_v47 }
  0x45   :  { %1785 = vmatprep.subr.bf16.mxu1 %v2319_v17 }
  0xf8   :  { %v159_v52 = vpop.f32.mrb[0].mxu0 }
  0xf9   :  { %v235_v53 = vadd.f32 %v159_v52, %v25_v49  ;;  %v161_v54 = vpop.f32.mrb[1].mxu0  ;;  %v1544_v49 = vld [vmem:[%s2981_s0 + $0x28] sm:$0xff] }
  0xfa   :  { %v236_v56 = vadd.f32 %v161_v54, %v26_v50  ;;  %v230_v61 = vpop.f32.mrb[0].mxu1 }
  0xfb   :  { %v239_v59 = vmul.f32 0.5, %v235_v53  ;;  %v237_v0 = vadd.f32 %v230_v61, %v27_v55  ;;  %v232_v1 = vpop.f32.mrb[1].mxu1 }
  0xfc   :  { %v243_v62 = vmul.f32 0.5, %v236_v56  ;;  %v238_v5 = vadd.f32 %v232_v1, %v28_v2  ;;  %v1545_v56 = vld [vmem:[%s2981_s0 + $0x30] sm:$0xff]  ;;  %v1546_v1 = vld [vmem:[%s2981_s0 + $0x38] sm:$0xff] }
  0xfd   :  { %2163 = vtanh.f32 %v239_v59 }
  0xfe   :  { %2165 = vtanh.f32 %v243_v62  ;;  %v248_v6 = vmul.f32 0.5, %v238_v5 }
  0xff   :  { %2167 = vtanh.f32 %v237_v0 }
 0x100   :  { %2169 = vtanh.f32 %v248_v6 }
 0x107   :  { %v2164_v11 = vpop.eup %2163 }
 0x108   :  { %v2166_v13 = vpop.eup %2165  ;;  %v241_v14 = vmul.f32 0.5, %v2164_v11 }
 0x109   :  { %v2168_v19 = vpop.eup %2167  ;;  %v245_v20 = vmul.f32 0.5, %v2166_v13 }
 0x10a   :  { %v242_v21 = vadd.f32 0.5, %v241_v14  ;;  %v2170_v33 = vpop.eup %2169 }
 0x10b   :  { %v246_v23 = vadd.f32 0.5, %v245_v20  ;;  %v250_v35 = vmul.f32 0.5, %v2170_v33 }
 0x10c   :  { %v253_v24 = vmul.f32 %v2168_v19, %v242_v21 }
 0x10d   :  { %v252_v28 = vmul.f32 0.0, %v246_v23  ;;  %v251_v37 = vadd.f32 0.5, %v250_v35 }
 0x10f   :  { %v2611_v31 = vadd.f32 %v253_v24, %v252_v28 }
 0x111   :  { %2171 = vtanh.f32 %v2611_v31 }
 0x11b   :  { %v2172_v38 = vpop.eup %2171 }
 0x11c   :  { %v256_v43 = vmul.f32 %v2172_v38, %v251_v37 }
 0x11e   :  { %327 = vmatmul.mubr.f32.vlgmr.msra.gmra.mrb[2].mxu0 %v256_v43  ;;  %398 = vmatmul.mubr.f32.vlgmr.msra.gmra.mrb[2].mxu1 %v256_v43 }
 0x11f   :  { %1755 = vmatpush1.bf16.msra.mxu0 %v2293_v8  ;;  %1787 = vmatpush1.bf16.msra.mxu1 %v2321_v18 }
 0x120   :  { %1757 = vmatprep.subr.bf16.mxu0 %v2295_v9  ;;  %1789 = vmatprep.subr.bf16.mxu1 %v2345_v26 }
 0x121   :  { %495 = vmatprep.mubr.f32.mxu0 %v2243_v3  ;;  %566 = vmatprep.mubr.f32.mxu1 %v2243_v3 }
 0x123   :  { %1759 = vmatpush1.bf16.msra.mxu0 %v2317_v16  ;;  %1791 = vmatpush1.bf16.msra.mxu1 %v2357_v30 }
 0x124   :  { %1761 = vmatprep.subr.bf16.mxu0 %v2333_v22  ;;  %1793 = vmatprep.subr.bf16.mxu1 %v2384_v39 }
 0x127   :  { %1763 = vmatpush1.bf16.msra.mxu0 %v2363_v32  ;;  %1795 = vmatpush1.bf16.msra.mxu1 %v2399_v44 }
 0x128   :  { %1765 = vmatprep.subr.bf16.mxu0 %v2376_v36  ;;  %1797 = vmatprep.subr.bf16.mxu1 %v2411_v48 }
 0x12b   :  { %1767 = vmatpush1.bf16.msra.mxu0 %v2405_v46  ;;  %1799 = vmatpush1.bf16.msra.mxu1 %v2438_v57 }
 0x12c   :  { %1769 = vmatprep.subr.bf16.mxu0 %v2420_v51  ;;  %1801 = vmatprep.subr.bf16.mxu1 %v2447_v60 }
 0x12f   :  { %1771 = vmatpush1.bf16.msra.mxu0 %v2441_v58  ;;  %1803 = vmatpush1.bf16.msra.mxu1 %v2474_v7 }
 0x130   :  { %1773 = vmatprep.subr.bf16.mxu0 %v2456_v63  ;;  %1805 = vmatprep.subr.bf16.mxu1 %v2483_v12 }
 0x133   :  { %1775 = vmatpush1.bf16.msra.mxu0 %v2477_v10  ;;  %1807 = vmatpush1.bf16.msra.mxu1 %v2510_v25 }
 0x134   :  { %1777 = vmatprep.subr.bf16.mxu0 %v2492_v15  ;;  %1809 = vmatprep.subr.bf16.mxu1 %v2519_v29 }
 0x137   :  { %1779 = vmatpush1.bf16.msra.mxu0 %v2513_v27  ;;  %1811 = vmatpush1.bf16.msra.mxu1 %v2540_v40 }
 0x138   :  { %1781 = vmatprep.subr.bf16.mxu0 %v2528_v34  ;;  %1813 = vmatprep.subr.bf16.mxu1 %v2546_v42 }
 0x13b   :  { %1783 = vmatpush1.bf16.msra.mxu0 %v2543_v41  ;;  %1815 = vmatpush1.bf16.msra.mxu1 %v2556_v47 }
 0x13c   :  { %1817 = vmatprep.subr.bf16.mxu0 %v2282_v4  ;;  %1849 = vmatprep.subr.bf16.mxu1 %v2319_v17 }
 0x1f1   :  { %v328_v50 = vpop.f32.mrb[2].mxu0  ;;  %v399_v52 = vpop.f32.mrb[2].mxu1 }
 0x1f2   :  { %v404_v53 = vadd.f32 %v1543_v45, %v328_v50  ;;  %v330_v54 = vpop.f32.mrb[3].mxu0  ;;  %v401_v55 = vpop.f32.mrb[3].mxu1  ;;  %v406_v0 = vadd.f32 %v1545_v56, %v399_v52  ;;  %v1548_v45 = vld [vmem:[%s2981_s0 + $0x48] sm:$0xff] }
 0x1f3   :  { %v405_v59 = vadd.f32 %v1544_v49, %v330_v54  ;;  %v407_v2 = vadd.f32 %v1546_v1, %v401_v55  ;;  %v1549_v55 = vld [vmem:[%s2981_s0 + $0x50] sm:$0xff] }
 0x1f4   :  { %v408_v61 = vmul.f32 0.5, %v404_v53 }
 0x1f5   :  { %v412_v62 = vmul.f32 0.5, %v405_v59  ;;  %v417_v5 = vmul.f32 0.5, %v407_v2 }
 0x1f6   :  { %2173 = vtanh.f32 %v408_v61 }
 0x1f7   :  { %2175 = vtanh.f32 %v412_v62 }
 0x1f8   :  { %2177 = vtanh.f32 %v406_v0  ;;  %v1550_v0 = vld [vmem:[%s2981_s0 + $0x58] sm:$0xff] }
 0x1f9   :  { %2179 = vtanh.f32 %v417_v5 }
 0x200   :  { %v2174_v6 = vpop.eup %2173 }
 0x201   :  { %v2176_v11 = vpop.eup %2175  ;;  %v410_v13 = vmul.f32 0.5, %v2174_v6 }
 0x202   :  { %v414_v14 = vmul.f32 0.5, %v2176_v11  ;;  %v2178_v20 = vpop.eup %2177 }
 0x203   :  { %v411_v19 = vadd.f32 0.5, %v410_v13  ;;  %v2180_v33 = vpop.eup %2179 }
 0x204   :  { %v415_v21 = vadd.f32 0.5, %v414_v14  ;;  %v419_v35 = vmul.f32 0.5, %v2180_v33 }
 0x205   :  { %v422_v23 = vmul.f32 %v2178_v20, %v411_v19 }
 0x206   :  { %v421_v24 = vmul.f32 %v415_v21, %v2611_v31  ;;  %v420_v37 = vadd.f32 0.5, %v419_v35  ;;  %v1547_v31 = vld [vmem:[%s2981_s0 + $0x40] sm:$0xff] }
 0x208   :  { %v2661_v28 = vadd.f32 %v422_v23, %v421_v24 }
 0x20a   :  { %2181 = vtanh.f32 %v2661_v28 }
 0x214   :  { %v2182_v38 = vpop.eup %2181 }
 0x215   :  { %v425_v43 = vmul.f32 %v2182_v38, %v420_v37 }
 0x217   :  { %496 = vmatmul.mubr.f32.vlgmr.msra.gmra.mrb[4].mxu0 %v425_v43  ;;  %567 = vmatmul.mubr.f32.vlgmr.msra.gmra.mrb[4].mxu1 %v425_v43 }
 0x218   :  { %1819 = vmatpush1.bf16.msra.mxu0 %v2293_v8  ;;  %1851 = vmatpush1.bf16.msra.mxu1 %v2321_v18 }
 0x219   :  { %1821 = vmatprep.subr.bf16.mxu0 %v2295_v9  ;;  %1853 = vmatprep.subr.bf16.mxu1 %v2345_v26 }
 0x21a   :  { %664 = vmatprep.mubr.f32.mxu0 %v2243_v3  ;;  %735 = vmatprep.mubr.f32.mxu1 %v2243_v3 }
 0x21c   :  { %1823 = vmatpush1.bf16.msra.mxu0 %v2317_v16  ;;  %1855 = vmatpush1.bf16.msra.mxu1 %v2357_v30 }
 0x21d   :  { %1825 = vmatprep.subr.bf16.mxu0 %v2333_v22  ;;  %1857 = vmatprep.subr.bf16.mxu1 %v2384_v39 }
 0x220   :  { %1827 = vmatpush1.bf16.msra.mxu0 %v2363_v32  ;;  %1859 = vmatpush1.bf16.msra.mxu1 %v2399_v44 }
 0x221   :  { %1829 = vmatprep.subr.bf16.mxu0 %v2376_v36  ;;  %1861 = vmatprep.subr.bf16.mxu1 %v2411_v48 }
 0x224   :  { %1831 = vmatpush1.bf16.msra.mxu0 %v2405_v46  ;;  %1863 = vmatpush1.bf16.msra.mxu1 %v2438_v57 }
 0x225   :  { %1833 = vmatprep.subr.bf16.mxu0 %v2420_v51  ;;  %1865 = vmatprep.subr.bf16.mxu1 %v2447_v60 }
 0x228   :  { %1835 = vmatpush1.bf16.msra.mxu0 %v2441_v58  ;;  %1867 = vmatpush1.bf16.msra.mxu1 %v2474_v7 }
 0x229   :  { %1837 = vmatprep.subr.bf16.mxu0 %v2456_v63  ;;  %1869 = vmatprep.subr.bf16.mxu1 %v2483_v12 }
 0x22c   :  { %1839 = vmatpush1.bf16.msra.mxu0 %v2477_v10  ;;  %1871 = vmatpush1.bf16.msra.mxu1 %v2510_v25 }
 0x22d   :  { %1841 = vmatprep.subr.bf16.mxu0 %v2492_v15  ;;  %1873 = vmatprep.subr.bf16.mxu1 %v2519_v29 }
 0x230   :  { %1843 = vmatpush1.bf16.msra.mxu0 %v2513_v27  ;;  %1875 = vmatpush1.bf16.msra.mxu1 %v2540_v40 }
 0x231   :  { %1845 = vmatprep.subr.bf16.mxu0 %v2528_v34  ;;  %1877 = vmatprep.subr.bf16.mxu1 %v2546_v42 }
 0x234   :  { %1847 = vmatpush1.bf16.msra.mxu0 %v2543_v41  ;;  %1879 = vmatpush1.bf16.msra.mxu1 %v2556_v47 }
 0x235   :  { %1881 = vmatprep.subr.bf16.mxu0 %v2282_v4  ;;  %1913 = vmatprep.subr.bf16.mxu1 %v2319_v17 }
 0x2ea   :  { %v497_v49 = vpop.f32.mrb[4].mxu0  ;;  %v568_v50 = vpop.f32.mrb[4].mxu1 }
 0x2eb   :  { %v573_v52 = vadd.f32 %v1547_v31, %v497_v49  ;;  %v499_v53 = vpop.f32.mrb[5].mxu0  ;;  %v570_v54 = vpop.f32.mrb[5].mxu1  ;;  %v575_v62 = vadd.f32 %v1549_v55, %v568_v50  ;;  %v1552_v31 = vld [vmem:[%s2981_s0 + $0x68] sm:$0xff] }
 0x2ec   :  { %v574_v56 = vadd.f32 %v1548_v45, %v499_v53  ;;  %v576_v1 = vadd.f32 %v1550_v0, %v570_v54  ;;  %v1553_v54 = vld [vmem:[%s2981_s0 + $0x70] sm:$0xff] }
 0x2ed   :  { %v577_v59 = vmul.f32 0.5, %v573_v52 }
 0x2ee   :  { %v581_v61 = vmul.f32 0.5, %v574_v56  ;;  %v586_v2 = vmul.f32 0.5, %v576_v1 }
 0x2ef   :  { %2183 = vtanh.f32 %v577_v59 }
 0x2f0   :  { %2185 = vtanh.f32 %v581_v61 }
 0x2f1   :  { %2187 = vtanh.f32 %v575_v62  ;;  %v1554_v62 = vld [vmem:[%s2981_s0 + $0x78] sm:$0xff] }
 0x2f2   :  { %2189 = vtanh.f32 %v586_v2 }
 0x2f9   :  { %v2184_v5 = vpop.eup %2183 }
 0x2fa   :  { %v2186_v6 = vpop.eup %2185  ;;  %v579_v11 = vmul.f32 0.5, %v2184_v5 }
 0x2fb   :  { %v583_v13 = vmul.f32 0.5, %v2186_v6  ;;  %v2188_v19 = vpop.eup %2187 }
 0x2fc   :  { %v580_v14 = vadd.f32 0.5, %v579_v11  ;;  %v2190_v33 = vpop.eup %2189 }
 0x2fd   :  { %v584_v20 = vadd.f32 0.5, %v583_v13  ;;  %v588_v35 = vmul.f32 0.5, %v2190_v33 }
 0x2fe   :  { %v591_v21 = vmul.f32 %v2188_v19, %v580_v14 }
 0x2ff   :  { %v590_v23 = vmul.f32 %v584_v20, %v2661_v28  ;;  %v589_v37 = vadd.f32 0.5, %v588_v35  ;;  %v1551_v28 = vld [vmem:[%s2981_s0 + $0x60] sm:$0xff] }
 0x301   :  { %v2711_v24 = vadd.f32 %v591_v21, %v590_v23 }
 0x303   :  { %2191 = vtanh.f32 %v2711_v24 }
 0x30d   :  { %v2192_v38 = vpop.eup %2191 }
 0x30e   :  { %v594_v43 = vmul.f32 %v2192_v38, %v589_v37 }
 0x310   :  { %665 = vmatmul.mubr.f32.vlgmr.msra.gmra.mrb[6].mxu0 %v594_v43  ;;  %736 = vmatmul.mubr.f32.vlgmr.msra.gmra.mrb[6].mxu1 %v594_v43 }
 0x311   :  { %1883 = vmatpush1.bf16.msra.mxu0 %v2293_v8  ;;  %1915 = vmatpush1.bf16.msra.mxu1 %v2321_v18 }
 0x312   :  { %1885 = vmatprep.subr.bf16.mxu0 %v2295_v9  ;;  %1917 = vmatprep.subr.bf16.mxu1 %v2345_v26 }
 0x313   :  { %833 = vmatprep.mubr.f32.mxu0 %v2243_v3  ;;  %904 = vmatprep.mubr.f32.mxu1 %v2243_v3 }
 0x315   :  { %1887 = vmatpush1.bf16.msra.mxu0 %v2317_v16  ;;  %1919 = vmatpush1.bf16.msra.mxu1 %v2357_v30 }
 0x316   :  { %1889 = vmatprep.subr.bf16.mxu0 %v2333_v22  ;;  %1921 = vmatprep.subr.bf16.mxu1 %v2384_v39 }
 0x319   :  { %1891 = vmatpush1.bf16.msra.mxu0 %v2363_v32  ;;  %1923 = vmatpush1.bf16.msra.mxu1 %v2399_v44 }
 0x31a   :  { %1893 = vmatprep.subr.bf16.mxu0 %v2376_v36  ;;  %1925 = vmatprep.subr.bf16.mxu1 %v2411_v48 }
 0x31d   :  { %1895 = vmatpush1.bf16.msra.mxu0 %v2405_v46  ;;  %1927 = vmatpush1.bf16.msra.mxu1 %v2438_v57 }
 0x31e   :  { %1897 = vmatprep.subr.bf16.mxu0 %v2420_v51  ;;  %1929 = vmatprep.subr.bf16.mxu1 %v2447_v60 }
 0x321   :  { %1899 = vmatpush1.bf16.msra.mxu0 %v2441_v58  ;;  %1931 = vmatpush1.bf16.msra.mxu1 %v2474_v7 }
 0x322   :  { %1901 = vmatprep.subr.bf16.mxu0 %v2456_v63  ;;  %1933 = vmatprep.subr.bf16.mxu1 %v2483_v12 }
 0x325   :  { %1903 = vmatpush1.bf16.msra.mxu0 %v2477_v10  ;;  %1935 = vmatpush1.bf16.msra.mxu1 %v2510_v25 }
 0x326   :  { %1905 = vmatprep.subr.bf16.mxu0 %v2492_v15  ;;  %1937 = vmatprep.subr.bf16.mxu1 %v2519_v29 }
 0x329   :  { %1907 = vmatpush1.bf16.msra.mxu0 %v2513_v27  ;;  %1939 = vmatpush1.bf16.msra.mxu1 %v2540_v40 }
 0x32a   :  { %1909 = vmatprep.subr.bf16.mxu0 %v2528_v34  ;;  %1941 = vmatprep.subr.bf16.mxu1 %v2546_v42 }
 0x32d   :  { %1911 = vmatpush1.bf16.msra.mxu0 %v2543_v41  ;;  %1943 = vmatpush1.bf16.msra.mxu1 %v2556_v47 }
 0x32e   :  { %1945 = vmatprep.subr.bf16.mxu0 %v2282_v4  ;;  %1977 = vmatprep.subr.bf16.mxu1 %v2319_v17 }
 0x3e3   :  { %v666_v45 = vpop.f32.mrb[6].mxu0  ;;  %v737_v49 = vpop.f32.mrb[6].mxu1 }
 0x3e4   :  { %v742_v50 = vadd.f32 %v1551_v28, %v666_v45  ;;  %v668_v52 = vpop.f32.mrb[7].mxu0  ;;  %v739_v53 = vpop.f32.mrb[7].mxu1  ;;  %v744_v61 = vadd.f32 %v1553_v54, %v737_v49  ;;  %v1556_v28 = vld [vmem:[%s2981_s0 + $0x88] sm:$0xff] }
 0x3e5   :  { %v743_v55 = vadd.f32 %v1552_v31, %v668_v52  ;;  %v745_v0 = vadd.f32 %v1554_v62, %v739_v53  ;;  %v1557_v53 = vld [vmem:[%s2981_s0 + $0x90] sm:$0xff] }
 0x3e6   :  { %v746_v56 = vmul.f32 0.5, %v742_v50 }
 0x3e7   :  { %v750_v59 = vmul.f32 0.5, %v743_v55  ;;  %v755_v1 = vmul.f32 0.5, %v745_v0 }
 0x3e8   :  { %2193 = vtanh.f32 %v746_v56 }
 0x3e9   :  { %2195 = vtanh.f32 %v750_v59 }
 0x3ea   :  { %2197 = vtanh.f32 %v744_v61  ;;  %v1558_v61 = vld [vmem:[%s2981_s0 + $0x98] sm:$0xff] }
 0x3eb   :  { %2199 = vtanh.f32 %v755_v1 }
 0x3f2   :  { %v2194_v2 = vpop.eup %2193 }
 0x3f3   :  { %v2196_v5 = vpop.eup %2195  ;;  %v748_v6 = vmul.f32 0.5, %v2194_v2 }
 0x3f4   :  { %v752_v11 = vmul.f32 0.5, %v2196_v5  ;;  %v2198_v14 = vpop.eup %2197 }
 0x3f5   :  { %v749_v13 = vadd.f32 0.5, %v748_v6  ;;  %v2200_v33 = vpop.eup %2199 }
 0x3f6   :  { %v753_v19 = vadd.f32 0.5, %v752_v11  ;;  %v757_v35 = vmul.f32 0.5, %v2200_v33 }
 0x3f7   :  { %v760_v20 = vmul.f32 %v2198_v14, %v749_v13 }
 0x3f8   :  { %v759_v21 = vmul.f32 %v753_v19, %v2711_v24  ;;  %v758_v37 = vadd.f32 0.5, %v757_v35  ;;  %v1555_v24 = vld [vmem:[%s2981_s0 + $0x80] sm:$0xff] }
 0x3fa   :  { %v2761_v23 = vadd.f32 %v760_v20, %v759_v21 }
 0x3fc   :  { %2201 = vtanh.f32 %v2761_v23 }
 0x406   :  { %v2202_v38 = vpop.eup %2201 }
 0x407   :  { %v763_v43 = vmul.f32 %v2202_v38, %v758_v37 }
 0x409   :  { %834 = vmatmul.mubr.f32.vlgmr.msra.gmra.mrb[8].mxu0 %v763_v43  ;;  %905 = vmatmul.mubr.f32.vlgmr.msra.gmra.mrb[8].mxu1 %v763_v43 }
 0x40a   :  { %1947 = vmatpush1.bf16.msra.mxu0 %v2293_v8  ;;  %1979 = vmatpush1.bf16.msra.mxu1 %v2321_v18 }
 0x40b   :  { %1949 = vmatprep.subr.bf16.mxu0 %v2295_v9  ;;  %1981 = vmatprep.subr.bf16.mxu1 %v2345_v26 }
 0x40c   :  { %1002 = vmatprep.mubr.f32.mxu0 %v2243_v3  ;;  %1073 = vmatprep.mubr.f32.mxu1 %v2243_v3 }
 0x40e   :  { %1951 = vmatpush1.bf16.msra.mxu0 %v2317_v16  ;;  %1983 = vmatpush1.bf16.msra.mxu1 %v2357_v30 }
 0x40f   :  { %1953 = vmatprep.subr.bf16.mxu0 %v2333_v22  ;;  %1985 = vmatprep.subr.bf16.mxu1 %v2384_v39 }
 0x412   :  { %1955 = vmatpush1.bf16.msra.mxu0 %v2363_v32  ;;  %1987 = vmatpush1.bf16.msra.mxu1 %v2399_v44 }
 0x413   :  { %1957 = vmatprep.subr.bf16.mxu0 %v2376_v36  ;;  %1989 = vmatprep.subr.bf16.mxu1 %v2411_v48 }
 0x416   :  { %1959 = vmatpush1.bf16.msra.mxu0 %v2405_v46  ;;  %1991 = vmatpush1.bf16.msra.mxu1 %v2438_v57 }
 0x417   :  { %1961 = vmatprep.subr.bf16.mxu0 %v2420_v51  ;;  %1993 = vmatprep.subr.bf16.mxu1 %v2447_v60 }
 0x41a   :  { %1963 = vmatpush1.bf16.msra.mxu0 %v2441_v58  ;;  %1995 = vmatpush1.bf16.msra.mxu1 %v2474_v7 }
 0x41b   :  { %1965 = vmatprep.subr.bf16.mxu0 %v2456_v63  ;;  %1997 = vmatprep.subr.bf16.mxu1 %v2483_v12 }
 0x41e   :  { %1967 = vmatpush1.bf16.msra.mxu0 %v2477_v10  ;;  %1999 = vmatpush1.bf16.msra.mxu1 %v2510_v25 }
 0x41f   :  { %1969 = vmatprep.subr.bf16.mxu0 %v2492_v15  ;;  %2001 = vmatprep.subr.bf16.mxu1 %v2519_v29 }
 0x422   :  { %1971 = vmatpush1.bf16.msra.mxu0 %v2513_v27  ;;  %2003 = vmatpush1.bf16.msra.mxu1 %v2540_v40 }
 0x423   :  { %1973 = vmatprep.subr.bf16.mxu0 %v2528_v34  ;;  %2005 = vmatprep.subr.bf16.mxu1 %v2546_v42 }
 0x426   :  { %1975 = vmatpush1.bf16.msra.mxu0 %v2543_v41  ;;  %2007 = vmatpush1.bf16.msra.mxu1 %v2556_v47 }
 0x427   :  { %2009 = vmatprep.subr.bf16.mxu0 %v2282_v4  ;;  %2041 = vmatprep.subr.bf16.mxu1 %v2319_v17 }
 0x4dc   :  { %v835_v31 = vpop.f32.mrb[8].mxu0  ;;  %v906_v45 = vpop.f32.mrb[8].mxu1 }
 0x4dd   :  { %v911_v49 = vadd.f32 %v1555_v24, %v835_v31  ;;  %v837_v50 = vpop.f32.mrb[9].mxu0  ;;  %v908_v52 = vpop.f32.mrb[9].mxu1  ;;  %v913_v59 = vadd.f32 %v1557_v53, %v906_v45  ;;  %v1560_v24 = vld [vmem:[%s2981_s0 + $0xa8] sm:$0xff] }
 0x4de   :  { %v912_v54 = vadd.f32 %v1556_v28, %v837_v50  ;;  %v914_v62 = vadd.f32 %v1558_v61, %v908_v52  ;;  %v1561_v52 = vld [vmem:[%s2981_s0 + $0xb0] sm:$0xff] }
 0x4df   :  { %v915_v55 = vmul.f32 0.5, %v911_v49 }
 0x4e0   :  { %v919_v56 = vmul.f32 0.5, %v912_v54  ;;  %v924_v0 = vmul.f32 0.5, %v914_v62 }
 0x4e1   :  { %2203 = vtanh.f32 %v915_v55  ;;  %v1562_v55 = vld [vmem:[%s2981_s0 + $0xb8] sm:$0xff] }
 0x4e2   :  { %2205 = vtanh.f32 %v919_v56 }
 0x4e3   :  { %2207 = vtanh.f32 %v913_v59 }
 0x4e4   :  { %2209 = vtanh.f32 %v924_v0 }
 0x4eb   :  { %v2204_v1 = vpop.eup %2203 }
 0x4ec   :  { %v2206_v2 = vpop.eup %2205  ;;  %v917_v5 = vmul.f32 0.5, %v2204_v1 }
 0x4ed   :  { %v921_v6 = vmul.f32 0.5, %v2206_v2  ;;  %v2208_v13 = vpop.eup %2207 }
 0x4ee   :  { %v918_v11 = vadd.f32 0.5, %v917_v5  ;;  %v2210_v33 = vpop.eup %2209 }
 0x4ef   :  { %v922_v14 = vadd.f32 0.5, %v921_v6  ;;  %v926_v35 = vmul.f32 0.5, %v2210_v33 }
 0x4f0   :  { %v929_v19 = vmul.f32 %v2208_v13, %v918_v11 }
 0x4f1   :  { %v928_v20 = vmul.f32 %v922_v14, %v2761_v23  ;;  %v927_v37 = vadd.f32 0.5, %v926_v35  ;;  %v1559_v23 = vld [vmem:[%s2981_s0 + $0xa0] sm:$0xff] }
 0x4f3   :  { %v2811_v21 = vadd.f32 %v929_v19, %v928_v20 }
 0x4f5   :  { %2211 = vtanh.f32 %v2811_v21 }
 0x4ff   :  { %v2212_v38 = vpop.eup %2211 }
 0x500   :  { %v932_v43 = vmul.f32 %v2212_v38, %v927_v37  ;;  %v1446_v38 = vld [vmem:[%s2982_s2 + $0x8] sm:$0xff] }
 0x502   :  { %1003 = vmatmul.mubr.f32.vlgmr.msra.gmra.mrb[10].mxu0 %v932_v43  ;;  %1074 = vmatmul.mubr.f32.vlgmr.msra.gmra.mrb[10].mxu1 %v932_v43 }
 0x503   :  { %2011 = vmatpush1.bf16.msra.mxu0 %v2293_v8  ;;  %2043 = vmatpush1.bf16.msra.mxu1 %v2321_v18 }
 0x504   :  { %2013 = vmatprep.subr.bf16.mxu0 %v2295_v9  ;;  %2045 = vmatprep.subr.bf16.mxu1 %v2345_v26 }
 0x505   :  { %1171 = vmatprep.mubr.f32.mxu0 %v2243_v3  ;;  %1242 = vmatprep.mubr.f32.mxu1 %v2243_v3 }
 0x507   :  { %2015 = vmatpush1.bf16.msra.mxu0 %v2317_v16  ;;  %2047 = vmatpush1.bf16.msra.mxu1 %v2357_v30 }
 0x508   :  { %2017 = vmatprep.subr.bf16.mxu0 %v2333_v22  ;;  %2049 = vmatprep.subr.bf16.mxu1 %v2384_v39 }
 0x50b   :  { %2019 = vmatpush1.bf16.msra.mxu0 %v2363_v32  ;;  %2051 = vmatpush1.bf16.msra.mxu1 %v2399_v44 }
 0x50c   :  { %2021 = vmatprep.subr.bf16.mxu0 %v2376_v36  ;;  %2053 = vmatprep.subr.bf16.mxu1 %v2411_v48 }
 0x50f   :  { %2023 = vmatpush1.bf16.msra.mxu0 %v2405_v46  ;;  %2055 = vmatpush1.bf16.msra.mxu1 %v2438_v57 }
 0x510   :  { %2025 = vmatprep.subr.bf16.mxu0 %v2420_v51  ;;  %2057 = vmatprep.subr.bf16.mxu1 %v2447_v60 }
 0x513   :  { %2027 = vmatpush1.bf16.msra.mxu0 %v2441_v58  ;;  %2059 = vmatpush1.bf16.msra.mxu1 %v2474_v7 }
 0x514   :  { %2029 = vmatprep.subr.bf16.mxu0 %v2456_v63  ;;  %2061 = vmatprep.subr.bf16.mxu1 %v2483_v12 }
 0x517   :  { %2031 = vmatpush1.bf16.msra.mxu0 %v2477_v10  ;;  %2063 = vmatpush1.bf16.msra.mxu1 %v2510_v25 }
 0x518   :  { %2033 = vmatprep.subr.bf16.mxu0 %v2492_v15  ;;  %2065 = vmatprep.subr.bf16.mxu1 %v2519_v29 }
 0x51b   :  { %2035 = vmatpush1.bf16.msra.mxu0 %v2513_v27  ;;  %2067 = vmatpush1.bf16.msra.mxu1 %v2540_v40 }
 0x51c   :  { %2037 = vmatprep.subr.bf16.mxu0 %v2528_v34  ;;  %2069 = vmatprep.subr.bf16.mxu1 %v2546_v42 }
 0x51f   :  { %2039 = vmatpush1.bf16.msra.mxu0 %v2543_v41  ;;  %2071 = vmatpush1.bf16.msra.mxu1 %v2556_v47 }
 0x520   :  { %2073 = vmatprep.subr.bf16.mxu0 %v2282_v4  ;;  %2105 = vmatprep.subr.bf16.mxu1 %v2319_v17 }
 0x5d5   :  { %v1004_v28 = vpop.f32.mrb[10].mxu0  ;;  %v1075_v31 = vpop.f32.mrb[10].mxu1 }
 0x5d6   :  { %v1080_v45 = vadd.f32 %v1559_v23, %v1004_v28  ;;  %v1006_v49 = vpop.f32.mrb[11].mxu0  ;;  %v1077_v50 = vpop.f32.mrb[11].mxu1  ;;  %v1082_v54 = vadd.f32 %v1561_v52, %v1075_v31  ;;  %v2244_v23 = vmov 0.0|0.0   ;;  %v1448_v28 = vld [vmem:[%s2982_s2 + $0x18] sm:$0xff]  ;;  %v1451_v52 = vld [vmem:[%s2982_s2 + $0x30] sm:$0xff] }
 0x5d7   :  { %v1081_v4 = vadd.f32 %v1560_v24, %v1006_v49  ;;  %v1083_v56 = vadd.f32 %v1562_v55, %v1077_v50  ;;  %v1447_v24 = vld [vmem:[%s2982_s2 + $0x10] sm:$0xff]  ;;  %v1450_v49 = vld [vmem:[%s2982_s2 + $0x28] sm:$0xff] }
 0x5d8   :  { %v1084_v53 = vmul.f32 0.5, %v1080_v45  ;;  %v2140_v31 = vpack.c.bf16 %v1448_v28, %v1447_v24  ;;  %v1449_v45 = vld [vmem:[%s2982_s2 + $0x20] sm:$0xff] }
 0x5d9   :  { %v1088_v17 = vmul.f32 0.5, %v1081_v4  ;;  %v1093_v59 = vmul.f32 0.5, %v1083_v56  ;;  %v2143_v50 = vpack.c.bf16 %v1450_v49, %v1449_v45  ;;  %v1452_v4 = vld [vmem:[%s2982_s2 + $0x38] sm:$0xff]  ;;  %v1455_v56 = vld [vmem:[%s2982_s2 + $0x50] sm:$0xff] }
 0x5da   :  { %2213 = vtanh.f32 %v1084_v53  ;;  %v2146_v53 = vpack.c.bf16 %v1452_v4, %v1451_v52 }
 0x5db   :  { %2215 = vtanh.f32 %v1088_v17  ;;  %v1453_v17 = vld [vmem:[%s2982_s2 + $0x40] sm:$0xff] }
 0x5dc   :  { %2217 = vtanh.f32 %v1082_v54  ;;  %v1454_v54 = vld [vmem:[%s2982_s2 + $0x48] sm:$0xff] }
 0x5dd   :  { %2219 = vtanh.f32 %v1093_v59  ;;  %v2149_v55 = vpack.c.bf16 %v1454_v54, %v1453_v17  ;;  %v1456_v59 = vld [vmem:[%s2982_s2 + $0x58] sm:$0xff] }
 0x5e4   :  { %v2214_v61 = vpop.eup %2213 }
 0x5e5   :  { %v2216_v62 = vpop.eup %2215  ;;  %v1086_v0 = vmul.f32 0.5, %v2214_v61  ;;  %v2152_v61 = vpack.c.bf16 %v1456_v59, %v1455_v56 }
 0x5e6   :  { %v1090_v1 = vmul.f32 0.5, %v2216_v62  ;;  %v2218_v5 = vpop.eup %2217  ;;  %v1457_v62 = vld [vmem:[%s2982_s2 + $0x60] sm:$0xff] }
 0x5e7   :  { %v1087_v2 = vadd.f32 0.5, %v1086_v0  ;;  %v2220_v19 = vpop.eup %2219  ;;  %v1458_v0 = vld [vmem:[%s2982_s2 + $0x68] sm:$0xff] }
 0x5e8   :  { %v1091_v6 = vadd.f32 0.5, %v1090_v1  ;;  %v1095_v20 = vmul.f32 0.5, %v2220_v19  ;;  %v2155_v1 = vpack.c.bf16 %v1458_v0, %v1457_v62 }
 0x5e9   :  { %v1098_v11 = vmul.f32 %v2218_v5, %v1087_v2  ;;  %v1459_v2 = vld [vmem:[%s2982_s2 + $0x70] sm:$0xff]  ;;  %v1460_v5 = vld [vmem:[%s2982_s2 + $0x78] sm:$0xff] }
 0x5ea   :  { %v1097_v13 = vmul.f32 %v1091_v6, %v2811_v21  ;;  %v1096_v33 = vadd.f32 0.5, %v1095_v20  ;;  %v1445_v21 = vld [vmem:[%s2982_s2] sm:$0xff]  ;;  %v2158_v6 = vpack.c.bf16 %v1460_v5, %v1459_v2 }
 0x5eb   :  { %v2137_v43 = vpack.c.bf16 %v1446_v38, %v1445_v21 }
 0x5ec   :  { %v2861_v14 = vadd.f32 %v1098_v11, %v1097_v13  ;;  %v1567_v11 = vld [vmem:[%s2981_s0 + $0xe0] sm:$0xff]  ;;  %v1568_v13 = vld [vmem:[%s2981_s0 + $0xe8] sm:$0xff] }
 0x5ee   :  { %2221 = vtanh.f32 %v2861_v14 }
 0x5f8   :  { %v2222_v35 = vpop.eup %2221 }
 0x5f9   :  { %v1101_v37 = vmul.f32 %v2222_v35, %v1096_v33 }
 0x5fb   :  { %1172 = vmatmul.mubr.f32.vlgmr.msra.gmra.mrb[12].mxu0 %v1101_v37  ;;  %1243 = vmatmul.mubr.f32.vlgmr.msra.gmra.mrb[12].mxu1 %v1101_v37  ;;  %v1569_v37 = vld [vmem:[%s2981_s0 + $0xf0] sm:$0xff] }
 0x5fc   :  { %2075 = vmatpush1.bf16.msra.mxu0 %v2293_v8  ;;  %2107 = vmatpush1.bf16.msra.mxu1 %v2321_v18  ;;  %v1563_v8 = vld [vmem:[%s2981_s0 + $0xc0] sm:$0xff] }
 0x5fd   :  { %2077 = vmatprep.subr.bf16.mxu0 %v2295_v9  ;;  %2109 = vmatprep.subr.bf16.mxu1 %v2345_v26  ;;  %v1564_v9 = vld [vmem:[%s2981_s0 + $0xc8] sm:$0xff] }
 0x5fe   :  { %1340 = vmatprep.mubr.f32.mxu0 %v2243_v3  ;;  %1411 = vmatprep.mubr.f32.mxu1 %v2243_v3 }
 0x600   :  { %2079 = vmatpush1.bf16.msra.mxu0 %v2317_v16  ;;  %2111 = vmatpush1.bf16.msra.mxu1 %v2357_v30 }
 0x601   :  { %2081 = vmatprep.subr.bf16.mxu0 %v2333_v22  ;;  %2113 = vmatprep.subr.bf16.mxu1 %v2384_v39 }
 0x604   :  { %2083 = vmatpush1.bf16.msra.mxu0 %v2363_v32  ;;  %2115 = vmatpush1.bf16.msra.mxu1 %v2399_v44  ;;  %v1565_v32 = vld [vmem:[%s2981_s0 + $0xd0] sm:$0xff] }
 0x605   :  { %2085 = vmatprep.subr.bf16.mxu0 %v2376_v36  ;;  %2117 = vmatprep.subr.bf16.mxu1 %v2411_v48  ;;  %v1566_v48 = vld [vmem:[%s2981_s0 + $0xd8] sm:$0xff] }
 0x608   :  { %2087 = vmatpush1.bf16.msra.mxu0 %v2405_v46  ;;  %2119 = vmatpush1.bf16.msra.mxu1 %v2438_v57 }
 0x609   :  { %2089 = vmatprep.subr.bf16.mxu0 %v2420_v51  ;;  %2121 = vmatprep.subr.bf16.mxu1 %v2447_v60 }
 0x60c   :  { %2091 = vmatpush1.bf16.msra.mxu0 %v2441_v58  ;;  %2123 = vmatpush1.bf16.msra.mxu1 %v2474_v7 }
 0x60d   :  { %2093 = vmatprep.subr.bf16.mxu0 %v2456_v63  ;;  %2125 = vmatprep.subr.bf16.mxu1 %v2483_v12 }
 0x610   :  { %2095 = vmatpush1.bf16.msra.mxu0 %v2477_v10  ;;  %2127 = vmatpush1.bf16.msra.mxu1 %v2510_v25 }
 0x611   :  { %2097 = vmatprep.subr.bf16.mxu0 %v2492_v15  ;;  %2129 = vmatprep.subr.bf16.mxu1 %v2519_v29 }
 0x614   :  { %2099 = vmatpush1.bf16.msra.mxu0 %v2513_v27  ;;  %2131 = vmatpush1.bf16.msra.mxu1 %v2540_v40 }
 0x615   :  { %2101 = vmatprep.subr.bf16.mxu0 %v2528_v34  ;;  %2133 = vmatprep.subr.bf16.mxu1 %v2546_v42 }
 0x618   :  { %2103 = vmatpush1.bf16.msra.mxu0 %v2543_v41  ;;  %2135 = vmatpush1.bf16.msra.mxu1 %v2556_v47 }
 0x619   :  { %2136 = vmatprep.subr.bf16.mxu0 %v2244_v23 }
 0x6ce   :  { %v1173_v16 = vpop.f32.mrb[12].mxu0  ;;  %v1244_v18 = vpop.f32.mrb[12].mxu1 }
 0x6cf   :  { %v1249_v22 = vadd.f32 %v1563_v8, %v1173_v16  ;;  %v1175_v26 = vpop.f32.mrb[13].mxu0  ;;  %v1246_v30 = vpop.f32.mrb[13].mxu1  ;;  %v1251_v46 = vadd.f32 %v1565_v32, %v1244_v18  ;;  %v1570_v18 = vld [vmem:[%s2981_s0 + $0xf8] sm:$0xff] }
 0x6d0   :  { %v1250_v36 = vadd.f32 %v1564_v9, %v1175_v26  ;;  %v1252_v51 = vadd.f32 %v1566_v48, %v1246_v30 }
 0x6d1   :  { %v1253_v39 = vmul.f32 0.5, %v1249_v22 }
 0x6d2   :  { %v1257_v44 = vmul.f32 0.5, %v1250_v36  ;;  %v1262_v57 = vmul.f32 0.5, %v1252_v51 }
 0x6d3   :  { %2223 = vtanh.f32 %v1253_v39 }
 0x6d4   :  { %2225 = vtanh.f32 %v1257_v44 }
 0x6d5   :  { %2227 = vtanh.f32 %v1251_v46 }
 0x6d6   :  { %2229 = vtanh.f32 %v1262_v57 }
 0x6dd   :  { %v2224_v58 = vpop.eup %2223 }
 0x6de   :  { %v2226_v60 = vpop.eup %2225  ;;  %v1255_v63 = vmul.f32 0.5, %v2224_v58 }
 0x6df   :  { %v1259_v7 = vmul.f32 0.5, %v2226_v60  ;;  %v2228_v12 = vpop.eup %2227 }
 0x6e0   :  { %v1256_v10 = vadd.f32 0.5, %v1255_v63  ;;  %v2230_v34 = vpop.eup %2229 }
 0x6e1   :  { %v1260_v15 = vadd.f32 0.5, %v1259_v7  ;;  %v1264_v40 = vmul.f32 0.5, %v2230_v34 }
 0x6e2   :  { %v1267_v25 = vmul.f32 %v2228_v12, %v1256_v10 }
 0x6e3   :  { %v1266_v27 = vmul.f32 %v1260_v15, %v2861_v14  ;;  %v1265_v41 = vadd.f32 0.5, %v1264_v40  ;;  %v1571_v15 = vld [vmem:[%s2983_s3] ss:$0 sm:$0xff] }
 0x6e5   :  { %v2909_v29 = vadd.f32 %v1267_v25, %v1266_v27 }
 0x6e7   :  { %2231 = vtanh.f32 %v2909_v29 }
 0x6f1   :  { %v2232_v42 = vpop.eup %2231 }
 0x6f2   :  { %v1270_v47 = vmul.f32 %v2232_v42, %v1265_v41 }
 0x6f4   :  { %1341 = vmatmul.mubr.f32.vlgmr.msra.gmra.mrb[14].mxu0 %v1270_v47  ;;  %1412 = vmatmul.mubr.f32.vlgmr.msra.gmra.mrb[14].mxu1 %v1270_v47 }
 0x6f5   :  { %2138 = vmatpush3.bf16.msra.mxu0 %v2137_v43  ;;  %1621 = vmatprep.mubr.msk.f32.mxu0 %vm2245_vm0, %v2243_v3 }
 0x6f6   :  { %2139 = vmatprep.subr.bf16.mxu0 %v2244_v23 }
 0x6f9   :  { %2141 = vmatpush3.bf16.msra.mxu0 %v2140_v31 }
 0x6fa   :  { %2142 = vmatprep.subr.bf16.mxu0 %v2244_v23 }
 0x6fd   :  { %2144 = vmatpush3.bf16.msra.mxu0 %v2143_v50 }
 0x6fe   :  { %2145 = vmatprep.subr.bf16.mxu0 %v2244_v23 }
 0x701   :  { %2147 = vmatpush3.bf16.msra.mxu0 %v2146_v53 }
 0x702   :  { %2148 = vmatprep.subr.bf16.mxu0 %v2244_v23 }
 0x705   :  { %2150 = vmatpush3.bf16.msra.mxu0 %v2149_v55 }
 0x706   :  { %2151 = vmatprep.subr.bf16.mxu0 %v2244_v23 }
 0x709   :  { %2153 = vmatpush3.bf16.msra.mxu0 %v2152_v61 }
 0x70a   :  { %2154 = vmatprep.subr.bf16.mxu0 %v2244_v23 }
 0x70d   :  { %2156 = vmatpush3.bf16.msra.mxu0 %v2155_v1 }
 0x70e   :  { %2157 = vmatprep.subr.bf16.mxu0 %v2244_v23 }
 0x711   :  { %2159 = vmatpush3.bf16.msra.mxu0 %v2158_v6 }
 0x7c7   :  { %v1342_v14 = vpop.f32.mrb[14].mxu0  ;;  %v1413_v19 = vpop.f32.mrb[14].mxu1 }
 0x7c8   :  { %v1418_v20 = vadd.f32 %v1567_v11, %v1342_v14  ;;  %v1344_v33 = vpop.f32.mrb[15].mxu0  ;;  %v1415_v35 = vpop.f32.mrb[15].mxu1  ;;  %v1420_v16 = vadd.f32 %v1569_v37, %v1413_v19 }
 0x7c9   :  { %v1419_v8 = vadd.f32 %v1568_v13, %v1344_v33  ;;  %v1421_v22 = vadd.f32 %v1570_v18, %v1415_v35 }
 0x7ca   :  { %v1422_v9 = vmul.f32 0.5, %v1418_v20 }
 0x7cb   :  { %v1426_v3 = vmul.f32 0.5, %v1419_v8  ;;  %v1431_v26 = vmul.f32 0.5, %v1421_v22 }
 0x7cc   :  { %2233 = vtanh.f32 %v1422_v9 }
 0x7cd   :  { %2235 = vtanh.f32 %v1426_v3 }
 0x7ce   :  { %2237 = vtanh.f32 %v1420_v16 }
 0x7cf   :  { %2239 = vtanh.f32 %v1431_v26 }
 0x7d6   :  { %v2234_v30 = vpop.eup %2233 }
 0x7d7   :  { %v2236_v32 = vpop.eup %2235  ;;  %v1424_v36 = vmul.f32 0.5, %v2234_v30 }
 0x7d8   :  { %v1428_v39 = vmul.f32 0.5, %v2236_v32  ;;  %v2238_v46 = vpop.eup %2237 }
 0x7d9   :  { %v1425_v44 = vadd.f32 0.5, %v1424_v36  ;;  %v2240_v60 = vpop.eup %2239 }
 0x7da   :  { %v1429_v48 = vadd.f32 0.5, %v1428_v39  ;;  %v1433_v63 = vmul.f32 0.5, %v2240_v60 }
 0x7db   :  { %v1436_v51 = vmul.f32 %v2238_v46, %v1425_v44 }
 0x7dc   :  { %v1435_v57 = vmul.f32 %v1429_v48, %v2909_v29  ;;  %v1434_v7 = vadd.f32 0.5, %v1433_v63 }
 0x7de   :  { %v1437_v58 = vadd.f32 %v1436_v51, %v1435_v57 }
 0x7e0   :  { %2241 = vtanh.f32 %v1437_v58 }
 0x7ea   :  { %v2242_v10 = vpop.eup %2241 }
 0x7eb   :  { %v1439_v12 = vmul.f32 %v2242_v10, %v1434_v7 }
 0x7ed   :  { %1622 = vmatmul.mubr.f32.vlgmr.msra.gmra.mrb[16].mxu0 %v1439_v12 }
 0x8c0   :  { %v1534_v25 = vpop.f32.mrb[16].mxu0 }
 0x8c1   :  { %v1535_v27 = vadd.f32 %v1571_v15, %v1534_v25  ;;  %v1623_v34 = vpop.f32.mrb[17].mxu0 }
 0x8c3   :  { %1538 = vst [vmem:[%s2984_s4] sm:$0xff] %v1535_v27 }

</bundles_post_ra>
